<compile_context>
chip_gen: v5e
topology: v5e:2x2
jax: 0.10.0
libtpu: 0.0.40
codegen_flags: <defaults>
</compile_context>

<pallas_src>
import functools

import jax
import jax.numpy as jnp
from jax import lax
from jax.experimental import pallas as pl
from jax.experimental.pallas import tpu as pltpu

NEG = -1.0e9  # finite stand-in for -inf inside the CTC DP (avoids inf/nan arithmetic)


def _round_up(x, m):
    return ((x + m - 1) // m) * m


# ---------------------------------------------------------------------------
# 1) Batched CTC loss kernel: grid = (batch groups of 8, time chunks).
# ---------------------------------------------------------------------------
def _ctc_kernel(logits_ref, ext_ref, inlen_ref, tgtlen_ref,     # inputs  (VMEM)
                out_ref,                                        # output  (VMEM) [BG, 1]
                em_ref, alpha_ref,                              # scratch (VMEM)
                *, unroll):
    TC, BG, V = logits_ref.shape
    Sp = ext_ref.shape[1]
    tc = pl.program_id(1)
    t0 = tc * TC

    # --- emissions for this time chunk: vectorized log_softmax (full sublanes) ---
    lg = logits_ref[...]                                        # [TC, BG, V]
    mx = jnp.max(lg, axis=-1, keepdims=True)
    z = lg - mx
    logp = z - jnp.log(jnp.sum(jnp.exp(z), axis=-1, keepdims=True))   # [TC, BG, V]

    ext = ext_ref[...]                                          # [BG, Sp] int32
    # one-hot gather via MXU, written TIME-MAJOR so the DP reads one [BG, Sp] slab / step
    for b in range(BG):                                         # static loop, off the DP path
        oh = (lax.broadcasted_iota(jnp.int32, (V, Sp), 0)
              == ext[b:b + 1, :]).astype(jnp.float32)           # [V, Sp]
        em_ref[:, b, :] = jnp.dot(logp[:, b, :], oh,
                                  preferred_element_type=jnp.float32)   # [TC, Sp]

    # --- DP: alpha carried across time chunks in VMEM scratch ---
    lane = lax.broadcasted_iota(jnp.int32, (BG, Sp), 1)
    ext_m2 = jnp.concatenate([jnp.zeros((BG, 2), jnp.int32), ext[:, :-2]], axis=1)
    skip = (ext != 0) & (ext != ext_m2)                         # s-2 transition allowed
    inlen = inlen_ref[...]                                      # [BG, 1] int32
    first2 = lane < 2

    @pl.when(tc == 0)
    def _():
        alpha_ref[...] = jnp.full_like(alpha_ref, NEG)

    def step(i, alpha):
        t = t0 + i
        et = em_ref[i]                                          # one contiguous [BG, Sp] load
        # lane rotations go to the (idle) XLU instead of slice+concat on the VPU
        a1 = jnp.where(lane >= 1, pltpu.roll(alpha, shift=1, axis=1), NEG)
        a2 = jnp.where((lane >= 2) & skip, pltpu.roll(alpha, shift=2, axis=1), NEG)
        m3 = jnp.maximum(alpha, jnp.maximum(a1, a2))
        m3s = jnp.where(m3 > NEG * 0.5, m3, 0.0)
        ssum = jnp.exp(alpha - m3s) + jnp.exp(a1 - m3s) + jnp.exp(a2 - m3s)
        new_alpha = jnp.maximum(et + m3s + jnp.log(ssum), NEG)
        # global t == 0: CTC initialization (first two extended positions)
        new_alpha = jnp.where(t == 0, jnp.where(first2, et, NEG), new_alpha)
        # only advance rows still inside their input length (also masks time padding)
        return jnp.where(t < inlen, new_alpha, alpha)

    alpha_ref[...] = lax.fori_loop(0, TC, step, alpha_ref[...], unroll=unroll)

    # --- finalize on the last time chunk: loss_b = -logsumexp(alpha[2*tl-1], alpha[2*tl]) ---
    @pl.when(tc == pl.num_programs(1) - 1)
    def _():
        alpha = alpha_ref[...]
        tl = tgtlen_ref[...]                                    # [BG, 1] int32
        vals = jnp.where((lane == 2 * tl - 1) | (lane == 2 * tl), alpha, NEG)
        mf = jnp.max(vals, axis=-1, keepdims=True)
        mfs = jnp.where(mf > NEG * 0.5, mf, 0.0)
        sf = jnp.sum(jnp.exp(vals - mfs), axis=-1, keepdims=True)
        out_ref[...] = -(mfs + jnp.log(sf))                     # [BG, 1]


def ctc_loss_pallas(logits_tbv, targets, input_lengths, target_lengths, blank=0):
    """PyTorch nn.CTCLoss(blank=0, reduction='none') on log_softmax(logits)."""
    assert blank == 0
    T, B, V = logits_tbv.shape
    S = targets.shape[1]
    Sp = _round_up(2 * S + 1, 128)                              # lane-pad extended targets
    BG = 8                                                      # 8 sequences per sublane group
    Bp = _round_up(B, BG)
    TC = T if T <= 128 else 128                                 # time-chunk (bounded VMEM)
    Tp = _round_up(T, TC)

    logits = logits_tbv.astype(jnp.float32)
    if (Tp, Bp) != (T, B):
        logits = jnp.pad(logits, ((0, Tp - T), (0, Bp - B), (0, 0)))
    ext = jnp.zeros((Bp, Sp), jnp.int32).at[:B, 1:2 * S:2].set(targets.astype(jnp.int32))
    inlen = jnp.zeros((Bp, 1), jnp.int32).at[:B, 0].set(input_lengths.astype(jnp.int32))
    tgtlen = jnp.ones((Bp, 1), jnp.int32).at[:B, 0].set(target_lengths.astype(jnp.int32))

    kernel = functools.partial(_ctc_kernel, unroll=(True if TC <= 32 else 4))
    losses = pl.pallas_call(
        kernel,
        grid=(Bp // BG, Tp // TC),
        in_specs=[
            pl.BlockSpec((TC, BG, V), lambda g, tc: (tc, g, 0)),   # logits time/batch block
            pl.BlockSpec((BG, Sp), lambda g, tc: (g, 0)),          # extended targets
            pl.BlockSpec((BG, 1), lambda g, tc: (g, 0)),           # input lengths
            pl.BlockSpec((BG, 1), lambda g, tc: (g, 0)),           # target lengths
        ],
        out_specs=pl.BlockSpec((BG, 1), lambda g, tc: (g, 0)),
        out_shape=jax.ShapeDtypeStruct((Bp, 1), jnp.float32),
        scratch_shapes=[pltpu.VMEM((TC, BG, Sp), jnp.float32),     # time-major emissions
                        pltpu.VMEM((BG, Sp), jnp.float32)],        # alpha carry
        compiler_params=pltpu.CompilerParams(
            dimension_semantics=("parallel", "arbitrary")),
    )(logits, ext, inlen, tgtlen)
    return losses[:B, 0]


# ---------------------------------------------------------------------------
# 2) Frozen pose head: one big bf16 MXU matmul over all (t, b) rows.
# ---------------------------------------------------------------------------
def _pose_head_kernel(x_ref, w_ref, b_ref, o_ref):
    o_ref[...] = jnp.dot(x_ref[...], w_ref[...],
                         preferred_element_type=jnp.float32) + b_ref[...]


def pose_head_pallas(frames_bf16, w_bf16, bias_f32):
    Rbt, D = frames_bf16.shape
    N = w_bf16.shape[1]
    TM = 256 if Rbt >= 256 else _round_up(Rbt, 16)
    Rp = _round_up(Rbt, TM)
    if Rp != Rbt:
        frames_bf16 = jnp.pad(frames_bf16, ((0, Rp - Rbt), (0, 0)))
    TN = N if N <= 512 else (512 if N % 512 == 0 else N)
    # TODO(synk): for real DWPose-sized heads also tile the D (contraction) axis and raise
    #             vmem_limit_bytes; the toy D fits in a single block per core.
    return pl.pallas_call(
        _pose_head_kernel,
        grid=(Rp // TM, N // TN),
        in_specs=[pl.BlockSpec((TM, D), lambda i, j: (i, 0)),      # frames (bf16)
                  pl.BlockSpec((D, TN), lambda i, j: (0, j)),      # fused head weights (bf16)
                  pl.BlockSpec((1, TN), lambda i, j: (0, j))],     # folded-normalization bias
        out_specs=pl.BlockSpec((TM, TN), lambda i, j: (i, j)),
        out_shape=jax.ShapeDtypeStruct((Rp, N), jnp.float32),
        compiler_params=pltpu.CompilerParams(
            dimension_semantics=("parallel", "parallel")),
    )(frames_bf16, w_bf16, bias_f32)


# ---------------------------------------------------------------------------
# 3) Distillation-KL kernel: rows = (t, b, k), lanes = SimCC bins (no keypoint loop).
# ---------------------------------------------------------------------------
def _kl_kernel(t_ref, ox_ref, oy_ref,                           # inputs  (VMEM)
               o_ref,                                           # output  (VMEM) [1, 128]
               *, Lx, Ly, inv_temp, r_valid):
    g = pl.program_id(0)

    @pl.when(g == 0)
    def _():
        o_ref[...] = jnp.zeros_like(o_ref)

    TR = t_ref.shape[0]
    row = lax.broadcasted_iota(jnp.int32, (TR, 1), 0) + g * TR
    valid = (row < r_valid).astype(jnp.float32)                 # mask padded rows

    t = t_ref[...]                                              # [TR, Lx+Ly] f32 (pose head)

    # --- X: F.kl_div(log_softmax(out_x), softmax(target_x / T))  ->  p*(log p - log q) ---
    tx = t[:, :Lx] * inv_temp
    mxt = jnp.max(tx, axis=-1, keepdims=True)
    ex = jnp.exp(tx - mxt)
    sx = jnp.sum(ex, axis=-1, keepdims=True)
    px = ex / sx
    log_px = (tx - mxt) - jnp.log(sx)
    oxv = ox_ref[...]
    mo = jnp.max(oxv, axis=-1, keepdims=True)
    zo = oxv - mo
    lqx = zo - jnp.log(jnp.sum(jnp.exp(zo), axis=-1, keepdims=True))
    kx = jnp.sum(valid * (px * (log_px - lqx)))

    # --- Y: F.kl_div(log_softmax(out_y), softmax(target_y / T), log_target=True)
    #        = exp(target)*(target - input) with target = probabilities (faithful to module) ---
    ty = t[:, Lx:Lx + Ly] * inv_temp
    myt = jnp.max(ty, axis=-1, keepdims=True)
    ey = jnp.exp(ty - myt)
    sy = jnp.sum(ey, axis=-1, keepdims=True)
    py = ey / sy
    oyv = oy_ref[...]
    moy = jnp.max(oyv, axis=-1, keepdims=True)
    zoy = oyv - moy
    lqy = zoy - jnp.log(jnp.sum(jnp.exp(zoy), axis=-1, keepdims=True))
    ky = jnp.sum(valid * (jnp.exp(py) * (py - lqy)))

    # lane-dense resident accumulator (single HBM writeback at grid end)
    lane = lax.broadcasted_iota(jnp.int32, (1, 128), 1)
    o_ref[...] = o_ref[...] + jnp.where(lane == 0, kx, 0.0) + jnp.where(lane == 1, ky, 0.0)


def _fit_rows(a, rows):
    r = a.shape[0]
    if r == rows:
        return a
    if r > rows:
        return a[:rows]
    return jnp.pad(a, ((0, rows - r), (0, 0)))


def kl_pallas(t_rows, ox_rows, oy_rows, *, Lx, Ly, temperature, r_valid):
    TR = 512 if r_valid >= 512 else _round_up(r_valid, 8)
    Rp = _round_up(r_valid, TR)
    t_rows = _fit_rows(t_rows, Rp)
    ox_rows = _fit_rows(ox_rows, Rp)
    oy_rows = _fit_rows(oy_rows, Rp)
    kernel = functools.partial(_kl_kernel, Lx=Lx, Ly=Ly,
                               inv_temp=float(1.0 / temperature), r_valid=r_valid)
    out = pl.pallas_call(
        kernel,
        grid=(Rp // TR,),
        in_specs=[pl.BlockSpec((TR, Lx + Ly), lambda g: (g, 0)),
                  pl.BlockSpec((TR, Lx), lambda g: (g, 0)),
                  pl.BlockSpec((TR, Ly), lambda g: (g, 0))],
        out_specs=pl.BlockSpec((1, 128), lambda g: (0, 0)),
        out_shape=jax.ShapeDtypeStruct((1, 128), jnp.float32),
        compiler_params=pltpu.CompilerParams(dimension_semantics=("arbitrary",)),
    )(t_rows, ox_rows, oy_rows)
    return out[0, 0], out[0, 1]


# ---------------------------------------------------------------------------
# MultiTaskDistillLoss.forward
# ---------------------------------------------------------------------------
def multi_task_distill_loss(outputs_out, simcc_out_x, simcc_out_y, t_length,
                            input_video, targets, target_lengths, pose_params,
                            ctc_weight=1.0, distill_weight=1.0, temperature=8.0,
                            dw_pose_input_size=(16, 16)):
    loss = jnp.float32(0.0)

    if ctc_weight > 0.0:
        per_batch = ctc_loss_pallas(outputs_out, targets, t_length, target_lengths)
        loss = loss + ctc_weight * jnp.mean(per_batch)

    if distill_weight > 0.0:
        T, B, K, Lx = simcc_out_x.shape
        Ly = simcc_out_y.shape[-1]
        Bv, C, Tv, H, W = input_video.shape
        Hp, Wp = dw_pose_input_size
        D = C * Hp * Wp

        # video -> time-major (t, b) frame rows so all later reshapes are free and
        # element-align with the [T, B, K, L] encoder outputs (XLA glue: resize/transpose)
        frames = jnp.transpose(input_video, (2, 0, 1, 3, 4)).reshape(Tv * Bv, C, H, W)
        frames = jax.image.resize(frames, (Tv * Bv, C, Hp, Wp), method="bilinear")
        frames_flat = frames.reshape(Tv * Bv, D).astype(jnp.bfloat16)   # halves input DMA bytes

        # TODO(synk): real DWPose backbone+SimCC head needs mmpose cfg/ckpt; frozen linear stand-in.
        # fold data_preprocessor normalization into the (bf16) head weights + f32 bias and
        # interleave wx|wy per keypoint so the head output reshapes freely to (t,b,k) rows
        mean_flat = jnp.repeat(pose_params["mean"], Hp * Wp).astype(jnp.float32)   # [D]
        std_flat = jnp.repeat(pose_params["std"], Hp * Wp).astype(jnp.float32)     # [D]
        wx3 = pose_params["wx"].reshape(D, K, Lx)
        wy3 = pose_params["wy"].reshape(D, K, Ly)
        w_cat = jnp.concatenate([wx3, wy3], axis=-1).reshape(D, K * (Lx + Ly))
        w_comb = (w_cat / std_flat[:, None]).astype(jnp.bfloat16)
        bias = (-(mean_flat / std_flat)[None, :] @ w_cat).astype(jnp.float32)      # [1, N]

        # frozen pose head: one [T*B, D] @ [D, K*(Lx+Ly)] MXU matmul (M = T*B, not T)
        t_comb = pose_head_pallas(frames_flat, w_comb, bias)                       # f32

        # free contiguous reshapes: rows = (t, b, k), lanes = SimCC bins
        t_rows = t_comb.reshape(-1, Lx + Ly)
        ox_rows = simcc_out_x.reshape(T * B * K, Lx).astype(jnp.float32)
        oy_rows = simcc_out_y.reshape(T * B * K, Ly).astype(jnp.float32)

        kx_sum, ky_sum = kl_pallas(t_rows, ox_rows, oy_rows, Lx=Lx, Ly=Ly,
                                   temperature=temperature, r_valid=T * B * K)
        # F.kl_div default reduction='mean' (element mean)
        kl_x = kx_sum / float(B * T * K * Lx)
        kl_y = ky_sum / float(B * T * K * Ly)
        loss = loss + distill_weight * (kl_x + kl_y)

    return loss


if __name__ == "__main__":
    key = jax.random.PRNGKey(0)
    k1, k2, k3, k4, k5, k6 = jax.random.split(key, 6)

    B, T, V = 2, 8, 16                 # batch, time, vocab (incl. blank=0)
    K = 4                              # keypoints
    C, H, W = 3, 16, 16                # video frame channels / spatial
    dw_pose_input_size = (16, 16)      # (H, W)
    simcc_split_ratio = 2.0
    Lx = int(dw_pose_input_size[1] * simcc_split_ratio)   # 32
    Ly = int(dw_pose_input_size[0] * simcc_split_ratio)   # 32
    S = 5                              # max target length

    outputs_out = jax.random.normal(k1, (T, B, V), jnp.float32)            # outputs.out
    simcc_out_x = jax.random.normal(k2, (T, B, K, Lx), jnp.float32)
    simcc_out_y = jax.random.normal(k3, (T, B, K, Ly), jnp.float32)
    t_length = jnp.array([T, T - 2], jnp.int32)                            # outputs.t_length
    input_video = jax.random.uniform(k4, (B, C, T, H, W), jnp.float32) * 255.0
    targets = jnp.array([[1, 2, 3, 4, 5], [2, 3, 4, 1, 1]], jnp.int32)     # padded targets
    target_lengths = jnp.array([5, 3], jnp.int32)

    # deterministic frozen "pose model" parameters (mmpose data_preprocessor mean/std values)
    D = C * dw_pose_input_size[0] * dw_pose_input_size[1]
    pose_params = {
        "mean": jnp.array([123.675, 116.28, 103.53], jnp.float32),
        "std": jnp.array([58.395, 57.12, 57.375], jnp.float32),
        "wx": jax.random.normal(k5, (D, K * Lx), jnp.float32) * 0.02,
        "wy": jax.random.normal(k6, (D, K * Ly), jnp.float32) * 0.02,
    }

    loss = multi_task_distill_loss(outputs_out, simcc_out_x, simcc_out_y, t_length,
                                   input_video, targets, target_lengths, pose_params,
                                   ctc_weight=1.0, distill_weight=1.0, temperature=8.0,
                                   dw_pose_input_size=dw_pose_input_size)
    loss = jax.block_until_ready(loss)
    assert bool(jnp.isfinite(loss)), f"non-finite loss: {loss}"
    print("KERNEL_OK")
</pallas_src>

<mosaic_0001>
module attributes {stable_mosaic.version = 11 : i64} {
  func.func @_ctc_kernel(%arg0: i32, %arg1: i32, %arg2: memref<8x8x16xf32, #tpu.memory_space<vmem>>, %arg3: memref<8x128xi32, #tpu.memory_space<vmem>>, %arg4: memref<8x1xi32, #tpu.memory_space<vmem>>, %arg5: memref<8x1xi32, #tpu.memory_space<vmem>>, %arg6: memref<8x1xf32, #tpu.memory_space<vmem>>, %arg7: memref<8x8x128xf32, #tpu.memory_space<vmem>>, %arg8: memref<8x128xf32, #tpu.memory_space<vmem>>) attributes {dimension_semantics = [#tpu.dimension_semantics<parallel>, #tpu.dimension_semantics<arbitrary>], iteration_bounds = array<i64: 1, 1>, scalar_prefetch = 0 : i64, scratch_operands = 2 : i64, tpu.core_type = #tpu.core_type<tc>, window_params = [{transform_indices = @transform_0, window_bounds = array<i64: 8, 8, 16>}, {transform_indices = @transform_1, window_bounds = array<i64: 8, 128>}, {transform_indices = @transform_2, window_bounds = array<i64: 8, 1>}, {transform_indices = @transform_3, window_bounds = array<i64: 8, 1>}, {transform_indices = @transform_4, window_bounds = array<i64: 8, 1>}]} {
    %c8_i32 = arith.constant 8 : i32
    %0 = arith.muli %arg1, %c8_i32 : i32
    %c0 = arith.constant 0 : index
    %c0_0 = arith.constant 0 : index
    %c0_1 = arith.constant 0 : index
    %1 = vector.load %arg2[%c0, %c0_0, %c0_1] : memref<8x8x16xf32, #tpu.memory_space<vmem>>, vector<8x8x16xf32>
    %cst = arith.constant dense<0xFF800000> : vector<8x8xf32>
    %2 = vector.multi_reduction <maximumf>, %1, %cst [2] : vector<8x8x16xf32> to vector<8x8xf32>
    %3 = vector.shape_cast %2 : vector<8x8xf32> to vector<8x8x1xf32>
    %4 = vector.broadcast %3 : vector<8x8x1xf32> to vector<8x8x16xf32>
    %5 = arith.subf %1, %4 : vector<8x8x16xf32>
    %6 = math.exp %5 : vector<8x8x16xf32>
    %cst_2 = arith.constant dense<0.000000e+00> : vector<8x8xf32>
    %7 = vector.multi_reduction <add>, %6, %cst_2 [2] : vector<8x8x16xf32> to vector<8x8xf32>
    %8 = vector.shape_cast %7 : vector<8x8xf32> to vector<8x8x1xf32>
    %9 = math.log %8 : vector<8x8x1xf32>
    %10 = vector.broadcast %9 : vector<8x8x1xf32> to vector<8x8x16xf32>
    %11 = arith.subf %5, %10 : vector<8x8x16xf32>
    %c0_3 = arith.constant 0 : index
    %c0_4 = arith.constant 0 : index
    %12 = vector.load %arg3[%c0_3, %c0_4] : memref<8x128xi32, #tpu.memory_space<vmem>>, vector<8x128xi32>
    %13 = tpu.iota {dimensions = array<i32: 0>} : vector<16x128xi32>
    %14 = vector.extract_strided_slice %12 {offsets = [0, 0], sizes = [1, 128], strides = [1, 1]} : vector<8x128xi32> to vector<1x128xi32>
    %15 = vector.broadcast %14 : vector<1x128xi32> to vector<16x128xi32>
    %16 = arith.cmpi eq, %13, %15 : vector<16x128xi32>
    %17 = arith.extui %16 : vector<16x128xi1> to vector<16x128xi32>
    %18 = arith.sitofp %17 : vector<16x128xi32> to vector<16x128xf32>
    %19 = vector.extract_strided_slice %11 {offsets = [0, 0, 0], sizes = [8, 1, 16], strides = [1, 1, 1]} : vector<8x8x16xf32> to vector<8x1x16xf32>
    %20 = vector.shape_cast %19 : vector<8x1x16xf32> to vector<8x16xf32>
    %cst_5 = arith.constant dense<0.000000e+00> : vector<8x128xf32>
    %21 = tpu.matmul %20, %18, %cst_5 {dimension_numbers = #tpu.dot_dimension_numbers<[1], [0], [0], [1], [0, 0, 1, 1], [], []>} : vector<8x16xf32>, vector<16x128xf32>, vector<8x128xf32> -> vector<8x128xf32>
    %c0_6 = arith.constant 0 : index
    %c0_7 = arith.constant 0 : index
    %c0_8 = arith.constant 0 : index
    %22 = vector.load %arg7[%c0_6, %c0_7, %c0_8] : memref<8x8x128xf32, #tpu.memory_space<vmem>>, vector<8x1x128xf32>
    %23 = vector.shape_cast %22 : vector<8x1x128xf32> to vector<8x128xf32>
    %24 = vector.shape_cast %21 : vector<8x128xf32> to vector<8x1x128xf32>
    tpu.vector_store %arg7[%c0_6, %c0_7, %c0_8], %24 {strides = array<i32>} : memref<8x8x128xf32, #tpu.memory_space<vmem>>, vector<8x1x128xf32>,
    %25 = tpu.iota {dimensions = array<i32: 0>} : vector<16x128xi32>
    %26 = vector.extract_strided_slice %12 {offsets = [1, 0], sizes = [1, 128], strides = [1, 1]} : vector<8x128xi32> to vector<1x128xi32>
    %27 = vector.broadcast %26 : vector<1x128xi32> to vector<16x128xi32>
    %28 = arith.cmpi eq, %25, %27 : vector<16x128xi32>
    %29 = arith.extui %28 : vector<16x128xi1> to vector<16x128xi32>
    %30 = arith.sitofp %29 : vector<16x128xi32> to vector<16x128xf32>
    %31 = vector.extract_strided_slice %11 {offsets = [0, 1, 0], sizes = [8, 1, 16], strides = [1, 1, 1]} : vector<8x8x16xf32> to vector<8x1x16xf32>
    %32 = vector.shape_cast %31 : vector<8x1x16xf32> to vector<8x16xf32>
    %cst_9 = arith.constant dense<0.000000e+00> : vector<8x128xf32>
    %33 = tpu.matmul %32, %30, %cst_9 {dimension_numbers = #tpu.dot_dimension_numbers<[1], [0], [0], [1], [0, 0, 1, 1], [], []>} : vector<8x16xf32>, vector<16x128xf32>, vector<8x128xf32> -> vector<8x128xf32>
    %c0_10 = arith.constant 0 : index
    %c1 = arith.constant 1 : index
    %c0_11 = arith.constant 0 : index
    %34 = vector.load %arg7[%c0_10, %c1, %c0_11] : memref<8x8x128xf32, #tpu.memory_space<vmem>>, vector<8x1x128xf32>
    %35 = vector.shape_cast %34 : vector<8x1x128xf32> to vector<8x128xf32>
    %36 = vector.shape_cast %33 : vector<8x128xf32> to vector<8x1x128xf32>
    tpu.vector_store %arg7[%c0_10, %c1, %c0_11], %36 {strides = array<i32>} : memref<8x8x128xf32, #tpu.memory_space<vmem>>, vector<8x1x128xf32>,
    %37 = tpu.iota {dimensions = array<i32: 0>} : vector<16x128xi32>
    %38 = vector.extract_strided_slice %12 {offsets = [2, 0], sizes = [1, 128], strides = [1, 1]} : vector<8x128xi32> to vector<1x128xi32>
    %39 = vector.broadcast %38 : vector<1x128xi32> to vector<16x128xi32>
    %40 = arith.cmpi eq, %37, %39 : vector<16x128xi32>
    %41 = arith.extui %40 : vector<16x128xi1> to vector<16x128xi32>
    %42 = arith.sitofp %41 : vector<16x128xi32> to vector<16x128xf32>
    %43 = vector.extract_strided_slice %11 {offsets = [0, 2, 0], sizes = [8, 1, 16], strides = [1, 1, 1]} : vector<8x8x16xf32> to vector<8x1x16xf32>
    %44 = vector.shape_cast %43 : vector<8x1x16xf32> to vector<8x16xf32>
    %cst_12 = arith.constant dense<0.000000e+00> : vector<8x128xf32>
    %45 = tpu.matmul %44, %42, %cst_12 {dimension_numbers = #tpu.dot_dimension_numbers<[1], [0], [0], [1], [0, 0, 1, 1], [], []>} : vector<8x16xf32>, vector<16x128xf32>, vector<8x128xf32> -> vector<8x128xf32>
    %c0_13 = arith.constant 0 : index
    %c2 = arith.constant 2 : index
    %c0_14 = arith.constant 0 : index
    %46 = vector.load %arg7[%c0_13, %c2, %c0_14] : memref<8x8x128xf32, #tpu.memory_space<vmem>>, vector<8x1x128xf32>
    %47 = vector.shape_cast %46 : vector<8x1x128xf32> to vector<8x128xf32>
    %48 = vector.shape_cast %45 : vector<8x128xf32> to vector<8x1x128xf32>
    tpu.vector_store %arg7[%c0_13, %c2, %c0_14], %48 {strides = array<i32>} : memref<8x8x128xf32, #tpu.memory_space<vmem>>, vector<8x1x128xf32>,
    %49 = tpu.iota {dimensions = array<i32: 0>} : vector<16x128xi32>
    %50 = vector.extract_strided_slice %12 {offsets = [3, 0], sizes = [1, 128], strides = [1, 1]} : vector<8x128xi32> to vector<1x128xi32>
    %51 = vector.broadcast %50 : vector<1x128xi32> to vector<16x128xi32>
    %52 = arith.cmpi eq, %49, %51 : vector<16x128xi32>
    %53 = arith.extui %52 : vector<16x128xi1> to vector<16x128xi32>
    %54 = arith.sitofp %53 : vector<16x128xi32> to vector<16x128xf32>
    %55 = vector.extract_strided_slice %11 {offsets = [0, 3, 0], sizes = [8, 1, 16], strides = [1, 1, 1]} : vector<8x8x16xf32> to vector<8x1x16xf32>
    %56 = vector.shape_cast %55 : vector<8x1x16xf32> to vector<8x16xf32>
    %cst_15 = arith.constant dense<0.000000e+00> : vector<8x128xf32>
    %57 = tpu.matmul %56, %54, %cst_15 {dimension_numbers = #tpu.dot_dimension_numbers<[1], [0], [0], [1], [0, 0, 1, 1], [], []>} : vector<8x16xf32>, vector<16x128xf32>, vector<8x128xf32> -> vector<8x128xf32>
    %c0_16 = arith.constant 0 : index
    %c3 = arith.constant 3 : index
    %c0_17 = arith.constant 0 : index
    %58 = vector.load %arg7[%c0_16, %c3, %c0_17] : memref<8x8x128xf32, #tpu.memory_space<vmem>>, vector<8x1x128xf32>
    %59 = vector.shape_cast %58 : vector<8x1x128xf32> to vector<8x128xf32>
    %60 = vector.shape_cast %57 : vector<8x128xf32> to vector<8x1x128xf32>
    tpu.vector_store %arg7[%c0_16, %c3, %c0_17], %60 {strides = array<i32>} : memref<8x8x128xf32, #tpu.memory_space<vmem>>, vector<8x1x128xf32>,
    %61 = tpu.iota {dimensions = array<i32: 0>} : vector<16x128xi32>
    %62 = vector.extract_strided_slice %12 {offsets = [4, 0], sizes = [1, 128], strides = [1, 1]} : vector<8x128xi32> to vector<1x128xi32>
    %63 = vector.broadcast %62 : vector<1x128xi32> to vector<16x128xi32>
    %64 = arith.cmpi eq, %61, %63 : vector<16x128xi32>
    %65 = arith.extui %64 : vector<16x128xi1> to vector<16x128xi32>
    %66 = arith.sitofp %65 : vector<16x128xi32> to vector<16x128xf32>
    %67 = vector.extract_strided_slice %11 {offsets = [0, 4, 0], sizes = [8, 1, 16], strides = [1, 1, 1]} : vector<8x8x16xf32> to vector<8x1x16xf32>
    %68 = vector.shape_cast %67 : vector<8x1x16xf32> to vector<8x16xf32>
    %cst_18 = arith.constant dense<0.000000e+00> : vector<8x128xf32>
    %69 = tpu.matmul %68, %66, %cst_18 {dimension_numbers = #tpu.dot_dimension_numbers<[1], [0], [0], [1], [0, 0, 1, 1], [], []>} : vector<8x16xf32>, vector<16x128xf32>, vector<8x128xf32> -> vector<8x128xf32>
    %c0_19 = arith.constant 0 : index
    %c4 = arith.constant 4 : index
    %c0_20 = arith.constant 0 : index
    %70 = vector.load %arg7[%c0_19, %c4, %c0_20] : memref<8x8x128xf32, #tpu.memory_space<vmem>>, vector<8x1x128xf32>
    %71 = vector.shape_cast %70 : vector<8x1x128xf32> to vector<8x128xf32>
    %72 = vector.shape_cast %69 : vector<8x128xf32> to vector<8x1x128xf32>
    tpu.vector_store %arg7[%c0_19, %c4, %c0_20], %72 {strides = array<i32>} : memref<8x8x128xf32, #tpu.memory_space<vmem>>, vector<8x1x128xf32>,
    %73 = tpu.iota {dimensions = array<i32: 0>} : vector<16x128xi32>
    %74 = vector.extract_strided_slice %12 {offsets = [5, 0], sizes = [1, 128], strides = [1, 1]} : vector<8x128xi32> to vector<1x128xi32>
    %75 = vector.broadcast %74 : vector<1x128xi32> to vector<16x128xi32>
    %76 = arith.cmpi eq, %73, %75 : vector<16x128xi32>
    %77 = arith.extui %76 : vector<16x128xi1> to vector<16x128xi32>
    %78 = arith.sitofp %77 : vector<16x128xi32> to vector<16x128xf32>
    %79 = vector.extract_strided_slice %11 {offsets = [0, 5, 0], sizes = [8, 1, 16], strides = [1, 1, 1]} : vector<8x8x16xf32> to vector<8x1x16xf32>
    %80 = vector.shape_cast %79 : vector<8x1x16xf32> to vector<8x16xf32>
    %cst_21 = arith.constant dense<0.000000e+00> : vector<8x128xf32>
    %81 = tpu.matmul %80, %78, %cst_21 {dimension_numbers = #tpu.dot_dimension_numbers<[1], [0], [0], [1], [0, 0, 1, 1], [], []>} : vector<8x16xf32>, vector<16x128xf32>, vector<8x128xf32> -> vector<8x128xf32>
    %c0_22 = arith.constant 0 : index
    %c5 = arith.constant 5 : index
    %c0_23 = arith.constant 0 : index
    %82 = vector.load %arg7[%c0_22, %c5, %c0_23] : memref<8x8x128xf32, #tpu.memory_space<vmem>>, vector<8x1x128xf32>
    %83 = vector.shape_cast %82 : vector<8x1x128xf32> to vector<8x128xf32>
    %84 = vector.shape_cast %81 : vector<8x128xf32> to vector<8x1x128xf32>
    tpu.vector_store %arg7[%c0_22, %c5, %c0_23], %84 {strides = array<i32>} : memref<8x8x128xf32, #tpu.memory_space<vmem>>, vector<8x1x128xf32>,
    %85 = tpu.iota {dimensions = array<i32: 0>} : vector<16x128xi32>
    %86 = vector.extract_strided_slice %12 {offsets = [6, 0], sizes = [1, 128], strides = [1, 1]} : vector<8x128xi32> to vector<1x128xi32>
    %87 = vector.broadcast %86 : vector<1x128xi32> to vector<16x128xi32>
    %88 = arith.cmpi eq, %85, %87 : vector<16x128xi32>
    %89 = arith.extui %88 : vector<16x128xi1> to vector<16x128xi32>
    %90 = arith.sitofp %89 : vector<16x128xi32> to vector<16x128xf32>
    %91 = vector.extract_strided_slice %11 {offsets = [0, 6, 0], sizes = [8, 1, 16], strides = [1, 1, 1]} : vector<8x8x16xf32> to vector<8x1x16xf32>
    %92 = vector.shape_cast %91 : vector<8x1x16xf32> to vector<8x16xf32>
    %cst_24 = arith.constant dense<0.000000e+00> : vector<8x128xf32>
    %93 = tpu.matmul %92, %90, %cst_24 {dimension_numbers = #tpu.dot_dimension_numbers<[1], [0], [0], [1], [0, 0, 1, 1], [], []>} : vector<8x16xf32>, vector<16x128xf32>, vector<8x128xf32> -> vector<8x128xf32>
    %c0_25 = arith.constant 0 : index
    %c6 = arith.constant 6 : index
    %c0_26 = arith.constant 0 : index
    %94 = vector.load %arg7[%c0_25, %c6, %c0_26] : memref<8x8x128xf32, #tpu.memory_space<vmem>>, vector<8x1x128xf32>
    %95 = vector.shape_cast %94 : vector<8x1x128xf32> to vector<8x128xf32>
    %96 = vector.shape_cast %93 : vector<8x128xf32> to vector<8x1x128xf32>
    tpu.vector_store %arg7[%c0_25, %c6, %c0_26], %96 {strides = array<i32>} : memref<8x8x128xf32, #tpu.memory_space<vmem>>, vector<8x1x128xf32>,
    %97 = tpu.iota {dimensions = array<i32: 0>} : vector<16x128xi32>
    %98 = vector.extract_strided_slice %12 {offsets = [7, 0], sizes = [1, 128], strides = [1, 1]} : vector<8x128xi32> to vector<1x128xi32>
    %99 = vector.broadcast %98 : vector<1x128xi32> to vector<16x128xi32>
    %100 = arith.cmpi eq, %97, %99 : vector<16x128xi32>
    %101 = arith.extui %100 : vector<16x128xi1> to vector<16x128xi32>
    %102 = arith.sitofp %101 : vector<16x128xi32> to vector<16x128xf32>
    %103 = vector.extract_strided_slice %11 {offsets = [0, 7, 0], sizes = [8, 1, 16], strides = [1, 1, 1]} : vector<8x8x16xf32> to vector<8x1x16xf32>
    %104 = vector.shape_cast %103 : vector<8x1x16xf32> to vector<8x16xf32>
    %cst_27 = arith.constant dense<0.000000e+00> : vector<8x128xf32>
    %105 = tpu.matmul %104, %102, %cst_27 {dimension_numbers = #tpu.dot_dimension_numbers<[1], [0], [0], [1], [0, 0, 1, 1], [], []>} : vector<8x16xf32>, vector<16x128xf32>, vector<8x128xf32> -> vector<8x128xf32>
    %c0_28 = arith.constant 0 : index
    %c7 = arith.constant 7 : index
    %c0_29 = arith.constant 0 : index
    %106 = vector.load %arg7[%c0_28, %c7, %c0_29] : memref<8x8x128xf32, #tpu.memory_space<vmem>>, vector<8x1x128xf32>
    %107 = vector.shape_cast %106 : vector<8x1x128xf32> to vector<8x128xf32>
    %108 = vector.shape_cast %105 : vector<8x128xf32> to vector<8x1x128xf32>
    tpu.vector_store %arg7[%c0_28, %c7, %c0_29], %108 {strides = array<i32>} : memref<8x8x128xf32, #tpu.memory_space<vmem>>, vector<8x1x128xf32>,
    %109 = tpu.iota {dimensions = array<i32: 1>} : vector<8x128xi32>
    %c0_i32 = arith.constant 0 : i32
    %110 = vector.broadcast %c0_i32 : i32 to vector<8x2xi32>
    %111 = vector.extract_strided_slice %12 {offsets = [0, 0], sizes = [8, 126], strides = [1, 1]} : vector<8x128xi32> to vector<8x126xi32>
    %112 = tpu.concatenate %110, %111 in 1 : vector<8x2xi32>, vector<8x126xi32> -> vector<8x128xi32>
    %c0_i32_30 = arith.constant 0 : i32
    %113 = vector.broadcast %c0_i32_30 : i32 to vector<8x128xi32>
    %114 = arith.cmpi ne, %12, %113 : vector<8x128xi32>
    %115 = arith.cmpi ne, %12, %112 : vector<8x128xi32>
    %116 = arith.andi %114, %115 : vector<8x128xi1>
    %c0_31 = arith.constant 0 : index
    %c0_32 = arith.constant 0 : index
    %117 = vector.load %arg4[%c0_31, %c0_32] : memref<8x1xi32, #tpu.memory_space<vmem>>, vector<8x1xi32>
    %c2_i32 = arith.constant 2 : i32
    %118 = vector.broadcast %c2_i32 : i32 to vector<8x128xi32>
    %119 = arith.cmpi slt, %109, %118 : vector<8x128xi32>
    %c0_i32_33 = arith.constant 0 : i32
    %120 = arith.cmpi eq, %arg1, %c0_i32_33 : i32
    %121 = arith.extui %120 : i1 to i32
    %c0_i32_34 = arith.constant 0 : i32
    %122 = arith.cmpi ne, %121, %c0_i32_34 : i32
    scf.if %122 {
      %cst_148 = arith.constant -1.000000e+09 : f32
      %472 = vector.broadcast %cst_148 : f32 to vector<8x128xf32>
      %c0_149 = arith.constant 0 : index
      %c0_150 = arith.constant 0 : index
      %473 = vector.load %arg8[%c0_149, %c0_150] : memref<8x128xf32, #tpu.memory_space<vmem>>, vector<8x128xf32>
      tpu.vector_store %arg8[%c0_149, %c0_150], %472 {strides = array<i32>} : memref<8x128xf32, #tpu.memory_space<vmem>>, vector<8x128xf32>,
    } else {
    }
    %c0_35 = arith.constant 0 : index
    %c0_36 = arith.constant 0 : index
    %123 = vector.load %arg8[%c0_35, %c0_36] : memref<8x128xf32, #tpu.memory_space<vmem>>, vector<8x128xf32>
    %c0_i32_37 = arith.constant 0 : i32
    %124 = arith.addi %0, %c0_i32_37 : i32
    %125 = arith.index_cast %c0_i32_37 : i32 to index
    %c0_38 = arith.constant 0 : index
    %c0_39 = arith.constant 0 : index
    %126 = vector.load %arg7[%125, %c0_38, %c0_39] : memref<8x8x128xf32, #tpu.memory_space<vmem>>, vector<1x8x128xf32>
    %127 = vector.shape_cast %126 : vector<1x8x128xf32> to vector<8x128xf32>
    %c1_i32 = arith.constant 1 : i32
    %128 = vector.broadcast %c1_i32 : i32 to vector<8x128xi32>
    %129 = arith.cmpi sge, %109, %128 : vector<8x128xi32>
    %c1_i32_40 = arith.constant 1 : i32
    %130 = tpu.dynamic_rotate %123 by %c1_i32_40 dim 1 : vector<8x128xf32>, i32 -> vector<8x128xf32>
    %cst_41 = arith.constant -1.000000e+09 : f32
    %131 = vector.broadcast %cst_41 : f32 to vector<8x128xf32>
    %132 = arith.select %129, %130, %131 : vector<8x128xi1>, vector<8x128xf32>
    %c2_i32_42 = arith.constant 2 : i32
    %133 = vector.broadcast %c2_i32_42 : i32 to vector<8x128xi32>
    %134 = arith.cmpi sge, %109, %133 : vector<8x128xi32>
    %135 = arith.andi %134, %116 : vector<8x128xi1>
    %c2_i32_43 = arith.constant 2 : i32
    %136 = tpu.dynamic_rotate %123 by %c2_i32_43 dim 1 : vector<8x128xf32>, i32 -> vector<8x128xf32>
    %cst_44 = arith.constant -1.000000e+09 : f32
    %137 = vector.broadcast %cst_44 : f32 to vector<8x128xf32>
    %138 = arith.select %135, %136, %137 : vector<8x128xi1>, vector<8x128xf32>
    %139 = arith.maximumf %132, %138 : vector<8x128xf32>
    %140 = arith.maximumf %123, %139 : vector<8x128xf32>
    %cst_45 = arith.constant -5.000000e+08 : f32
    %141 = vector.broadcast %cst_45 : f32 to vector<8x128xf32>
    %142 = arith.cmpf ogt, %140, %141 : vector<8x128xf32>
    %cst_46 = arith.constant 0.000000e+00 : f32
    %143 = vector.broadcast %cst_46 : f32 to vector<8x128xf32>
    %144 = arith.select %142, %140, %143 : vector<8x128xi1>, vector<8x128xf32>
    %145 = arith.subf %123, %144 : vector<8x128xf32>
    %146 = math.exp %145 : vector<8x128xf32>
    %147 = arith.subf %132, %144 : vector<8x128xf32>
    %148 = math.exp %147 : vector<8x128xf32>
    %149 = arith.addf %146, %148 : vector<8x128xf32>
    %150 = arith.subf %138, %144 : vector<8x128xf32>
    %151 = math.exp %150 : vector<8x128xf32>
    %152 = arith.addf %149, %151 : vector<8x128xf32>
    %153 = arith.addf %127, %144 : vector<8x128xf32>
    %154 = math.log %152 : vector<8x128xf32>
    %155 = arith.addf %153, %154 : vector<8x128xf32>
    %cst_47 = arith.constant -1.000000e+09 : f32
    %156 = vector.broadcast %cst_47 : f32 to vector<8x128xf32>
    %157 = arith.maximumf %155, %156 : vector<8x128xf32>
    %c0_i32_48 = arith.constant 0 : i32
    %158 = arith.cmpi eq, %124, %c0_i32_48 : i32
    %cst_49 = arith.constant -1.000000e+09 : f32
    %159 = vector.broadcast %cst_49 : f32 to vector<8x128xf32>
    %160 = arith.select %119, %127, %159 : vector<8x128xi1>, vector<8x128xf32>
    %161 = arith.select %158, %160, %157 : vector<8x128xf32>
    %162 = vector.broadcast %124 : i32 to vector<8x1xi32>
    %163 = arith.cmpi slt, %162, %117 : vector<8x1xi32>
    %164 = vector.shape_cast %163 : vector<8x1xi1> to vector<8x1xi1>
    %165 = vector.broadcast %164 : vector<8x1xi1> to vector<8x128xi1>
    %166 = arith.select %165, %161, %123 : vector<8x128xi1>, vector<8x128xf32>
    %c1_i32_50 = arith.constant 1 : i32
    %167 = arith.addi %0, %c1_i32_50 : i32
    %168 = arith.index_cast %c1_i32_50 : i32 to index
    %c0_51 = arith.constant 0 : index
    %c0_52 = arith.constant 0 : index
    %169 = vector.load %arg7[%168, %c0_51, %c0_52] : memref<8x8x128xf32, #tpu.memory_space<vmem>>, vector<1x8x128xf32>
    %170 = vector.shape_cast %169 : vector<1x8x128xf32> to vector<8x128xf32>
    %c1_i32_53 = arith.constant 1 : i32
    %171 = vector.broadcast %c1_i32_53 : i32 to vector<8x128xi32>
    %172 = arith.cmpi sge, %109, %171 : vector<8x128xi32>
    %c1_i32_54 = arith.constant 1 : i32
    %173 = tpu.dynamic_rotate %166 by %c1_i32_54 dim 1 : vector<8x128xf32>, i32 -> vector<8x128xf32>
    %cst_55 = arith.constant -1.000000e+09 : f32
    %174 = vector.broadcast %cst_55 : f32 to vector<8x128xf32>
    %175 = arith.select %172, %173, %174 : vector<8x128xi1>, vector<8x128xf32>
    %c2_i32_56 = arith.constant 2 : i32
    %176 = vector.broadcast %c2_i32_56 : i32 to vector<8x128xi32>
    %177 = arith.cmpi sge, %109, %176 : vector<8x128xi32>
    %178 = arith.andi %177, %116 : vector<8x128xi1>
    %c2_i32_57 = arith.constant 2 : i32
    %179 = tpu.dynamic_rotate %166 by %c2_i32_57 dim 1 : vector<8x128xf32>, i32 -> vector<8x128xf32>
    %cst_58 = arith.constant -1.000000e+09 : f32
    %180 = vector.broadcast %cst_58 : f32 to vector<8x128xf32>
    %181 = arith.select %178, %179, %180 : vector<8x128xi1>, vector<8x128xf32>
    %182 = arith.maximumf %175, %181 : vector<8x128xf32>
    %183 = arith.maximumf %166, %182 : vector<8x128xf32>
    %cst_59 = arith.constant -5.000000e+08 : f32
    %184 = vector.broadcast %cst_59 : f32 to vector<8x128xf32>
    %185 = arith.cmpf ogt, %183, %184 : vector<8x128xf32>
    %cst_60 = arith.constant 0.000000e+00 : f32
    %186 = vector.broadcast %cst_60 : f32 to vector<8x128xf32>
    %187 = arith.select %185, %183, %186 : vector<8x128xi1>, vector<8x128xf32>
    %188 = arith.subf %166, %187 : vector<8x128xf32>
    %189 = math.exp %188 : vector<8x128xf32>
    %190 = arith.subf %175, %187 : vector<8x128xf32>
    %191 = math.exp %190 : vector<8x128xf32>
    %192 = arith.addf %189, %191 : vector<8x128xf32>
    %193 = arith.subf %181, %187 : vector<8x128xf32>
    %194 = math.exp %193 : vector<8x128xf32>
    %195 = arith.addf %192, %194 : vector<8x128xf32>
    %196 = arith.addf %170, %187 : vector<8x128xf32>
    %197 = math.log %195 : vector<8x128xf32>
    %198 = arith.addf %196, %197 : vector<8x128xf32>
    %cst_61 = arith.constant -1.000000e+09 : f32
    %199 = vector.broadcast %cst_61 : f32 to vector<8x128xf32>
    %200 = arith.maximumf %198, %199 : vector<8x128xf32>
    %c0_i32_62 = arith.constant 0 : i32
    %201 = arith.cmpi eq, %167, %c0_i32_62 : i32
    %cst_63 = arith.constant -1.000000e+09 : f32
    %202 = vector.broadcast %cst_63 : f32 to vector<8x128xf32>
    %203 = arith.select %119, %170, %202 : vector<8x128xi1>, vector<8x128xf32>
    %204 = arith.select %201, %203, %200 : vector<8x128xf32>
    %205 = vector.broadcast %167 : i32 to vector<8x1xi32>
    %206 = arith.cmpi slt, %205, %117 : vector<8x1xi32>
    %207 = vector.shape_cast %206 : vector<8x1xi1> to vector<8x1xi1>
    %208 = vector.broadcast %207 : vector<8x1xi1> to vector<8x128xi1>
    %209 = arith.select %208, %204, %166 : vector<8x128xi1>, vector<8x128xf32>
    %c2_i32_64 = arith.constant 2 : i32
    %210 = arith.addi %0, %c2_i32_64 : i32
    %211 = arith.index_cast %c2_i32_64 : i32 to index
    %c0_65 = arith.constant 0 : index
    %c0_66 = arith.constant 0 : index
    %212 = vector.load %arg7[%211, %c0_65, %c0_66] : memref<8x8x128xf32, #tpu.memory_space<vmem>>, vector<1x8x128xf32>
    %213 = vector.shape_cast %212 : vector<1x8x128xf32> to vector<8x128xf32>
    %c1_i32_67 = arith.constant 1 : i32
    %214 = vector.broadcast %c1_i32_67 : i32 to vector<8x128xi32>
    %215 = arith.cmpi sge, %109, %214 : vector<8x128xi32>
    %c1_i32_68 = arith.constant 1 : i32
    %216 = tpu.dynamic_rotate %209 by %c1_i32_68 dim 1 : vector<8x128xf32>, i32 -> vector<8x128xf32>
    %cst_69 = arith.constant -1.000000e+09 : f32
    %217 = vector.broadcast %cst_69 : f32 to vector<8x128xf32>
    %218 = arith.select %215, %216, %217 : vector<8x128xi1>, vector<8x128xf32>
    %c2_i32_70 = arith.constant 2 : i32
    %219 = vector.broadcast %c2_i32_70 : i32 to vector<8x128xi32>
    %220 = arith.cmpi sge, %109, %219 : vector<8x128xi32>
    %221 = arith.andi %220, %116 : vector<8x128xi1>
    %c2_i32_71 = arith.constant 2 : i32
    %222 = tpu.dynamic_rotate %209 by %c2_i32_71 dim 1 : vector<8x128xf32>, i32 -> vector<8x128xf32>
    %cst_72 = arith.constant -1.000000e+09 : f32
    %223 = vector.broadcast %cst_72 : f32 to vector<8x128xf32>
    %224 = arith.select %221, %222, %223 : vector<8x128xi1>, vector<8x128xf32>
    %225 = arith.maximumf %218, %224 : vector<8x128xf32>
    %226 = arith.maximumf %209, %225 : vector<8x128xf32>
    %cst_73 = arith.constant -5.000000e+08 : f32
    %227 = vector.broadcast %cst_73 : f32 to vector<8x128xf32>
    %228 = arith.cmpf ogt, %226, %227 : vector<8x128xf32>
    %cst_74 = arith.constant 0.000000e+00 : f32
    %229 = vector.broadcast %cst_74 : f32 to vector<8x128xf32>
    %230 = arith.select %228, %226, %229 : vector<8x128xi1>, vector<8x128xf32>
    %231 = arith.subf %209, %230 : vector<8x128xf32>
    %232 = math.exp %231 : vector<8x128xf32>
    %233 = arith.subf %218, %230 : vector<8x128xf32>
    %234 = math.exp %233 : vector<8x128xf32>
    %235 = arith.addf %232, %234 : vector<8x128xf32>
    %236 = arith.subf %224, %230 : vector<8x128xf32>
    %237 = math.exp %236 : vector<8x128xf32>
    %238 = arith.addf %235, %237 : vector<8x128xf32>
    %239 = arith.addf %213, %230 : vector<8x128xf32>
    %240 = math.log %238 : vector<8x128xf32>
    %241 = arith.addf %239, %240 : vector<8x128xf32>
    %cst_75 = arith.constant -1.000000e+09 : f32
    %242 = vector.broadcast %cst_75 : f32 to vector<8x128xf32>
    %243 = arith.maximumf %241, %242 : vector<8x128xf32>
    %c0_i32_76 = arith.constant 0 : i32
    %244 = arith.cmpi eq, %210, %c0_i32_76 : i32
    %cst_77 = arith.constant -1.000000e+09 : f32
    %245 = vector.broadcast %cst_77 : f32 to vector<8x128xf32>
    %246 = arith.select %119, %213, %245 : vector<8x128xi1>, vector<8x128xf32>
    %247 = arith.select %244, %246, %243 : vector<8x128xf32>
    %248 = vector.broadcast %210 : i32 to vector<8x1xi32>
    %249 = arith.cmpi slt, %248, %117 : vector<8x1xi32>
    %250 = vector.shape_cast %249 : vector<8x1xi1> to vector<8x1xi1>
    %251 = vector.broadcast %250 : vector<8x1xi1> to vector<8x128xi1>
    %252 = arith.select %251, %247, %209 : vector<8x128xi1>, vector<8x128xf32>
    %c3_i32 = arith.constant 3 : i32
    %253 = arith.addi %0, %c3_i32 : i32
    %254 = arith.index_cast %c3_i32 : i32 to index
    %c0_78 = arith.constant 0 : index
    %c0_79 = arith.constant 0 : index
    %255 = vector.load %arg7[%254, %c0_78, %c0_79] : memref<8x8x128xf32, #tpu.memory_space<vmem>>, vector<1x8x128xf32>
    %256 = vector.shape_cast %255 : vector<1x8x128xf32> to vector<8x128xf32>
    %c1_i32_80 = arith.constant 1 : i32
    %257 = vector.broadcast %c1_i32_80 : i32 to vector<8x128xi32>
    %258 = arith.cmpi sge, %109, %257 : vector<8x128xi32>
    %c1_i32_81 = arith.constant 1 : i32
    %259 = tpu.dynamic_rotate %252 by %c1_i32_81 dim 1 : vector<8x128xf32>, i32 -> vector<8x128xf32>
    %cst_82 = arith.constant -1.000000e+09 : f32
    %260 = vector.broadcast %cst_82 : f32 to vector<8x128xf32>
    %261 = arith.select %258, %259, %260 : vector<8x128xi1>, vector<8x128xf32>
    %c2_i32_83 = arith.constant 2 : i32
    %262 = vector.broadcast %c2_i32_83 : i32 to vector<8x128xi32>
    %263 = arith.cmpi sge, %109, %262 : vector<8x128xi32>
    %264 = arith.andi %263, %116 : vector<8x128xi1>
    %c2_i32_84 = arith.constant 2 : i32
    %265 = tpu.dynamic_rotate %252 by %c2_i32_84 dim 1 : vector<8x128xf32>, i32 -> vector<8x128xf32>
    %cst_85 = arith.constant -1.000000e+09 : f32
    %266 = vector.broadcast %cst_85 : f32 to vector<8x128xf32>
    %267 = arith.select %264, %265, %266 : vector<8x128xi1>, vector<8x128xf32>
    %268 = arith.maximumf %261, %267 : vector<8x128xf32>
    %269 = arith.maximumf %252, %268 : vector<8x128xf32>
    %cst_86 = arith.constant -5.000000e+08 : f32
    %270 = vector.broadcast %cst_86 : f32 to vector<8x128xf32>
    %271 = arith.cmpf ogt, %269, %270 : vector<8x128xf32>
    %cst_87 = arith.constant 0.000000e+00 : f32
    %272 = vector.broadcast %cst_87 : f32 to vector<8x128xf32>
    %273 = arith.select %271, %269, %272 : vector<8x128xi1>, vector<8x128xf32>
    %274 = arith.subf %252, %273 : vector<8x128xf32>
    %275 = math.exp %274 : vector<8x128xf32>
    %276 = arith.subf %261, %273 : vector<8x128xf32>
    %277 = math.exp %276 : vector<8x128xf32>
    %278 = arith.addf %275, %277 : vector<8x128xf32>
    %279 = arith.subf %267, %273 : vector<8x128xf32>
    %280 = math.exp %279 : vector<8x128xf32>
    %281 = arith.addf %278, %280 : vector<8x128xf32>
    %282 = arith.addf %256, %273 : vector<8x128xf32>
    %283 = math.log %281 : vector<8x128xf32>
    %284 = arith.addf %282, %283 : vector<8x128xf32>
    %cst_88 = arith.constant -1.000000e+09 : f32
    %285 = vector.broadcast %cst_88 : f32 to vector<8x128xf32>
    %286 = arith.maximumf %284, %285 : vector<8x128xf32>
    %c0_i32_89 = arith.constant 0 : i32
    %287 = arith.cmpi eq, %253, %c0_i32_89 : i32
    %cst_90 = arith.constant -1.000000e+09 : f32
    %288 = vector.broadcast %cst_90 : f32 to vector<8x128xf32>
    %289 = arith.select %119, %256, %288 : vector<8x128xi1>, vector<8x128xf32>
    %290 = arith.select %287, %289, %286 : vector<8x128xf32>
    %291 = vector.broadcast %253 : i32 to vector<8x1xi32>
    %292 = arith.cmpi slt, %291, %117 : vector<8x1xi32>
    %293 = vector.shape_cast %292 : vector<8x1xi1> to vector<8x1xi1>
    %294 = vector.broadcast %293 : vector<8x1xi1> to vector<8x128xi1>
    %295 = arith.select %294, %290, %252 : vector<8x128xi1>, vector<8x128xf32>
    %c4_i32 = arith.constant 4 : i32
    %296 = arith.addi %0, %c4_i32 : i32
    %297 = arith.index_cast %c4_i32 : i32 to index
    %c0_91 = arith.constant 0 : index
    %c0_92 = arith.constant 0 : index
    %298 = vector.load %arg7[%297, %c0_91, %c0_92] : memref<8x8x128xf32, #tpu.memory_space<vmem>>, vector<1x8x128xf32>
    %299 = vector.shape_cast %298 : vector<1x8x128xf32> to vector<8x128xf32>
    %c1_i32_93 = arith.constant 1 : i32
    %300 = vector.broadcast %c1_i32_93 : i32 to vector<8x128xi32>
    %301 = arith.cmpi sge, %109, %300 : vector<8x128xi32>
    %c1_i32_94 = arith.constant 1 : i32
    %302 = tpu.dynamic_rotate %295 by %c1_i32_94 dim 1 : vector<8x128xf32>, i32 -> vector<8x128xf32>
    %cst_95 = arith.constant -1.000000e+09 : f32
    %303 = vector.broadcast %cst_95 : f32 to vector<8x128xf32>
    %304 = arith.select %301, %302, %303 : vector<8x128xi1>, vector<8x128xf32>
    %c2_i32_96 = arith.constant 2 : i32
    %305 = vector.broadcast %c2_i32_96 : i32 to vector<8x128xi32>
    %306 = arith.cmpi sge, %109, %305 : vector<8x128xi32>
    %307 = arith.andi %306, %116 : vector<8x128xi1>
    %c2_i32_97 = arith.constant 2 : i32
    %308 = tpu.dynamic_rotate %295 by %c2_i32_97 dim 1 : vector<8x128xf32>, i32 -> vector<8x128xf32>
    %cst_98 = arith.constant -1.000000e+09 : f32
    %309 = vector.broadcast %cst_98 : f32 to vector<8x128xf32>
    %310 = arith.select %307, %308, %309 : vector<8x128xi1>, vector<8x128xf32>
    %311 = arith.maximumf %304, %310 : vector<8x128xf32>
    %312 = arith.maximumf %295, %311 : vector<8x128xf32>
    %cst_99 = arith.constant -5.000000e+08 : f32
    %313 = vector.broadcast %cst_99 : f32 to vector<8x128xf32>
    %314 = arith.cmpf ogt, %312, %313 : vector<8x128xf32>
    %cst_100 = arith.constant 0.000000e+00 : f32
    %315 = vector.broadcast %cst_100 : f32 to vector<8x128xf32>
    %316 = arith.select %314, %312, %315 : vector<8x128xi1>, vector<8x128xf32>
    %317 = arith.subf %295, %316 : vector<8x128xf32>
    %318 = math.exp %317 : vector<8x128xf32>
    %319 = arith.subf %304, %316 : vector<8x128xf32>
    %320 = math.exp %319 : vector<8x128xf32>
    %321 = arith.addf %318, %320 : vector<8x128xf32>
    %322 = arith.subf %310, %316 : vector<8x128xf32>
    %323 = math.exp %322 : vector<8x128xf32>
    %324 = arith.addf %321, %323 : vector<8x128xf32>
    %325 = arith.addf %299, %316 : vector<8x128xf32>
    %326 = math.log %324 : vector<8x128xf32>
    %327 = arith.addf %325, %326 : vector<8x128xf32>
    %cst_101 = arith.constant -1.000000e+09 : f32
    %328 = vector.broadcast %cst_101 : f32 to vector<8x128xf32>
    %329 = arith.maximumf %327, %328 : vector<8x128xf32>
    %c0_i32_102 = arith.constant 0 : i32
    %330 = arith.cmpi eq, %296, %c0_i32_102 : i32
    %cst_103 = arith.constant -1.000000e+09 : f32
    %331 = vector.broadcast %cst_103 : f32 to vector<8x128xf32>
    %332 = arith.select %119, %299, %331 : vector<8x128xi1>, vector<8x128xf32>
    %333 = arith.select %330, %332, %329 : vector<8x128xf32>
    %334 = vector.broadcast %296 : i32 to vector<8x1xi32>
    %335 = arith.cmpi slt, %334, %117 : vector<8x1xi32>
    %336 = vector.shape_cast %335 : vector<8x1xi1> to vector<8x1xi1>
    %337 = vector.broadcast %336 : vector<8x1xi1> to vector<8x128xi1>
    %338 = arith.select %337, %333, %295 : vector<8x128xi1>, vector<8x128xf32>
    %c5_i32 = arith.constant 5 : i32
    %339 = arith.addi %0, %c5_i32 : i32
    %340 = arith.index_cast %c5_i32 : i32 to index
    %c0_104 = arith.constant 0 : index
    %c0_105 = arith.constant 0 : index
    %341 = vector.load %arg7[%340, %c0_104, %c0_105] : memref<8x8x128xf32, #tpu.memory_space<vmem>>, vector<1x8x128xf32>
    %342 = vector.shape_cast %341 : vector<1x8x128xf32> to vector<8x128xf32>
    %c1_i32_106 = arith.constant 1 : i32
    %343 = vector.broadcast %c1_i32_106 : i32 to vector<8x128xi32>
    %344 = arith.cmpi sge, %109, %343 : vector<8x128xi32>
    %c1_i32_107 = arith.constant 1 : i32
    %345 = tpu.dynamic_rotate %338 by %c1_i32_107 dim 1 : vector<8x128xf32>, i32 -> vector<8x128xf32>
    %cst_108 = arith.constant -1.000000e+09 : f32
    %346 = vector.broadcast %cst_108 : f32 to vector<8x128xf32>
    %347 = arith.select %344, %345, %346 : vector<8x128xi1>, vector<8x128xf32>
    %c2_i32_109 = arith.constant 2 : i32
    %348 = vector.broadcast %c2_i32_109 : i32 to vector<8x128xi32>
    %349 = arith.cmpi sge, %109, %348 : vector<8x128xi32>
    %350 = arith.andi %349, %116 : vector<8x128xi1>
    %c2_i32_110 = arith.constant 2 : i32
    %351 = tpu.dynamic_rotate %338 by %c2_i32_110 dim 1 : vector<8x128xf32>, i32 -> vector<8x128xf32>
    %cst_111 = arith.constant -1.000000e+09 : f32
    %352 = vector.broadcast %cst_111 : f32 to vector<8x128xf32>
    %353 = arith.select %350, %351, %352 : vector<8x128xi1>, vector<8x128xf32>
    %354 = arith.maximumf %347, %353 : vector<8x128xf32>
    %355 = arith.maximumf %338, %354 : vector<8x128xf32>
    %cst_112 = arith.constant -5.000000e+08 : f32
    %356 = vector.broadcast %cst_112 : f32 to vector<8x128xf32>
    %357 = arith.cmpf ogt, %355, %356 : vector<8x128xf32>
    %cst_113 = arith.constant 0.000000e+00 : f32
    %358 = vector.broadcast %cst_113 : f32 to vector<8x128xf32>
    %359 = arith.select %357, %355, %358 : vector<8x128xi1>, vector<8x128xf32>
    %360 = arith.subf %338, %359 : vector<8x128xf32>
    %361 = math.exp %360 : vector<8x128xf32>
    %362 = arith.subf %347, %359 : vector<8x128xf32>
    %363 = math.exp %362 : vector<8x128xf32>
    %364 = arith.addf %361, %363 : vector<8x128xf32>
    %365 = arith.subf %353, %359 : vector<8x128xf32>
    %366 = math.exp %365 : vector<8x128xf32>
    %367 = arith.addf %364, %366 : vector<8x128xf32>
    %368 = arith.addf %342, %359 : vector<8x128xf32>
    %369 = math.log %367 : vector<8x128xf32>
    %370 = arith.addf %368, %369 : vector<8x128xf32>
    %cst_114 = arith.constant -1.000000e+09 : f32
    %371 = vector.broadcast %cst_114 : f32 to vector<8x128xf32>
    %372 = arith.maximumf %370, %371 : vector<8x128xf32>
    %c0_i32_115 = arith.constant 0 : i32
    %373 = arith.cmpi eq, %339, %c0_i32_115 : i32
    %cst_116 = arith.constant -1.000000e+09 : f32
    %374 = vector.broadcast %cst_116 : f32 to vector<8x128xf32>
    %375 = arith.select %119, %342, %374 : vector<8x128xi1>, vector<8x128xf32>
    %376 = arith.select %373, %375, %372 : vector<8x128xf32>
    %377 = vector.broadcast %339 : i32 to vector<8x1xi32>
    %378 = arith.cmpi slt, %377, %117 : vector<8x1xi32>
    %379 = vector.shape_cast %378 : vector<8x1xi1> to vector<8x1xi1>
    %380 = vector.broadcast %379 : vector<8x1xi1> to vector<8x128xi1>
    %381 = arith.select %380, %376, %338 : vector<8x128xi1>, vector<8x128xf32>
    %c6_i32 = arith.constant 6 : i32
    %382 = arith.addi %0, %c6_i32 : i32
    %383 = arith.index_cast %c6_i32 : i32 to index
    %c0_117 = arith.constant 0 : index
    %c0_118 = arith.constant 0 : index
    %384 = vector.load %arg7[%383, %c0_117, %c0_118] : memref<8x8x128xf32, #tpu.memory_space<vmem>>, vector<1x8x128xf32>
    %385 = vector.shape_cast %384 : vector<1x8x128xf32> to vector<8x128xf32>
    %c1_i32_119 = arith.constant 1 : i32
    %386 = vector.broadcast %c1_i32_119 : i32 to vector<8x128xi32>
    %387 = arith.cmpi sge, %109, %386 : vector<8x128xi32>
    %c1_i32_120 = arith.constant 1 : i32
    %388 = tpu.dynamic_rotate %381 by %c1_i32_120 dim 1 : vector<8x128xf32>, i32 -> vector<8x128xf32>
    %cst_121 = arith.constant -1.000000e+09 : f32
    %389 = vector.broadcast %cst_121 : f32 to vector<8x128xf32>
    %390 = arith.select %387, %388, %389 : vector<8x128xi1>, vector<8x128xf32>
    %c2_i32_122 = arith.constant 2 : i32
    %391 = vector.broadcast %c2_i32_122 : i32 to vector<8x128xi32>
    %392 = arith.cmpi sge, %109, %391 : vector<8x128xi32>
    %393 = arith.andi %392, %116 : vector<8x128xi1>
    %c2_i32_123 = arith.constant 2 : i32
    %394 = tpu.dynamic_rotate %381 by %c2_i32_123 dim 1 : vector<8x128xf32>, i32 -> vector<8x128xf32>
    %cst_124 = arith.constant -1.000000e+09 : f32
    %395 = vector.broadcast %cst_124 : f32 to vector<8x128xf32>
    %396 = arith.select %393, %394, %395 : vector<8x128xi1>, vector<8x128xf32>
    %397 = arith.maximumf %390, %396 : vector<8x128xf32>
    %398 = arith.maximumf %381, %397 : vector<8x128xf32>
    %cst_125 = arith.constant -5.000000e+08 : f32
    %399 = vector.broadcast %cst_125 : f32 to vector<8x128xf32>
    %400 = arith.cmpf ogt, %398, %399 : vector<8x128xf32>
    %cst_126 = arith.constant 0.000000e+00 : f32
    %401 = vector.broadcast %cst_126 : f32 to vector<8x128xf32>
    %402 = arith.select %400, %398, %401 : vector<8x128xi1>, vector<8x128xf32>
    %403 = arith.subf %381, %402 : vector<8x128xf32>
    %404 = math.exp %403 : vector<8x128xf32>
    %405 = arith.subf %390, %402 : vector<8x128xf32>
    %406 = math.exp %405 : vector<8x128xf32>
    %407 = arith.addf %404, %406 : vector<8x128xf32>
    %408 = arith.subf %396, %402 : vector<8x128xf32>
    %409 = math.exp %408 : vector<8x128xf32>
    %410 = arith.addf %407, %409 : vector<8x128xf32>
    %411 = arith.addf %385, %402 : vector<8x128xf32>
    %412 = math.log %410 : vector<8x128xf32>
    %413 = arith.addf %411, %412 : vector<8x128xf32>
    %cst_127 = arith.constant -1.000000e+09 : f32
    %414 = vector.broadcast %cst_127 : f32 to vector<8x128xf32>
    %415 = arith.maximumf %413, %414 : vector<8x128xf32>
    %c0_i32_128 = arith.constant 0 : i32
    %416 = arith.cmpi eq, %382, %c0_i32_128 : i32
    %cst_129 = arith.constant -1.000000e+09 : f32
    %417 = vector.broadcast %cst_129 : f32 to vector<8x128xf32>
    %418 = arith.select %119, %385, %417 : vector<8x128xi1>, vector<8x128xf32>
    %419 = arith.select %416, %418, %415 : vector<8x128xf32>
    %420 = vector.broadcast %382 : i32 to vector<8x1xi32>
    %421 = arith.cmpi slt, %420, %117 : vector<8x1xi32>
    %422 = vector.shape_cast %421 : vector<8x1xi1> to vector<8x1xi1>
    %423 = vector.broadcast %422 : vector<8x1xi1> to vector<8x128xi1>
    %424 = arith.select %423, %419, %381 : vector<8x128xi1>, vector<8x128xf32>
    %c7_i32 = arith.constant 7 : i32
    %425 = arith.addi %0, %c7_i32 : i32
    %426 = arith.index_cast %c7_i32 : i32 to index
    %c0_130 = arith.constant 0 : index
    %c0_131 = arith.constant 0 : index
    %427 = vector.load %arg7[%426, %c0_130, %c0_131] : memref<8x8x128xf32, #tpu.memory_space<vmem>>, vector<1x8x128xf32>
    %428 = vector.shape_cast %427 : vector<1x8x128xf32> to vector<8x128xf32>
    %c1_i32_132 = arith.constant 1 : i32
    %429 = vector.broadcast %c1_i32_132 : i32 to vector<8x128xi32>
    %430 = arith.cmpi sge, %109, %429 : vector<8x128xi32>
    %c1_i32_133 = arith.constant 1 : i32
    %431 = tpu.dynamic_rotate %424 by %c1_i32_133 dim 1 : vector<8x128xf32>, i32 -> vector<8x128xf32>
    %cst_134 = arith.constant -1.000000e+09 : f32
    %432 = vector.broadcast %cst_134 : f32 to vector<8x128xf32>
    %433 = arith.select %430, %431, %432 : vector<8x128xi1>, vector<8x128xf32>
    %c2_i32_135 = arith.constant 2 : i32
    %434 = vector.broadcast %c2_i32_135 : i32 to vector<8x128xi32>
    %435 = arith.cmpi sge, %109, %434 : vector<8x128xi32>
    %436 = arith.andi %435, %116 : vector<8x128xi1>
    %c2_i32_136 = arith.constant 2 : i32
    %437 = tpu.dynamic_rotate %424 by %c2_i32_136 dim 1 : vector<8x128xf32>, i32 -> vector<8x128xf32>
    %cst_137 = arith.constant -1.000000e+09 : f32
    %438 = vector.broadcast %cst_137 : f32 to vector<8x128xf32>
    %439 = arith.select %436, %437, %438 : vector<8x128xi1>, vector<8x128xf32>
    %440 = arith.maximumf %433, %439 : vector<8x128xf32>
    %441 = arith.maximumf %424, %440 : vector<8x128xf32>
    %cst_138 = arith.constant -5.000000e+08 : f32
    %442 = vector.broadcast %cst_138 : f32 to vector<8x128xf32>
    %443 = arith.cmpf ogt, %441, %442 : vector<8x128xf32>
    %cst_139 = arith.constant 0.000000e+00 : f32
    %444 = vector.broadcast %cst_139 : f32 to vector<8x128xf32>
    %445 = arith.select %443, %441, %444 : vector<8x128xi1>, vector<8x128xf32>
    %446 = arith.subf %424, %445 : vector<8x128xf32>
    %447 = math.exp %446 : vector<8x128xf32>
    %448 = arith.subf %433, %445 : vector<8x128xf32>
    %449 = math.exp %448 : vector<8x128xf32>
    %450 = arith.addf %447, %449 : vector<8x128xf32>
    %451 = arith.subf %439, %445 : vector<8x128xf32>
    %452 = math.exp %451 : vector<8x128xf32>
    %453 = arith.addf %450, %452 : vector<8x128xf32>
    %454 = arith.addf %428, %445 : vector<8x128xf32>
    %455 = math.log %453 : vector<8x128xf32>
    %456 = arith.addf %454, %455 : vector<8x128xf32>
    %cst_140 = arith.constant -1.000000e+09 : f32
    %457 = vector.broadcast %cst_140 : f32 to vector<8x128xf32>
    %458 = arith.maximumf %456, %457 : vector<8x128xf32>
    %c0_i32_141 = arith.constant 0 : i32
    %459 = arith.cmpi eq, %425, %c0_i32_141 : i32
    %cst_142 = arith.constant -1.000000e+09 : f32
    %460 = vector.broadcast %cst_142 : f32 to vector<8x128xf32>
    %461 = arith.select %119, %428, %460 : vector<8x128xi1>, vector<8x128xf32>
    %462 = arith.select %459, %461, %458 : vector<8x128xf32>
    %463 = vector.broadcast %425 : i32 to vector<8x1xi32>
    %464 = arith.cmpi slt, %463, %117 : vector<8x1xi32>
    %465 = vector.shape_cast %464 : vector<8x1xi1> to vector<8x1xi1>
    %466 = vector.broadcast %465 : vector<8x1xi1> to vector<8x128xi1>
    %467 = arith.select %466, %462, %424 : vector<8x128xi1>, vector<8x128xf32>
    %c8_i32_143 = arith.constant 8 : i32
    %c0_144 = arith.constant 0 : index
    %c0_145 = arith.constant 0 : index
    %468 = vector.load %arg8[%c0_144, %c0_145] : memref<8x128xf32, #tpu.memory_space<vmem>>, vector<8x128xf32>
    tpu.vector_store %arg8[%c0_144, %c0_145], %467 {strides = array<i32>} : memref<8x128xf32, #tpu.memory_space<vmem>>, vector<8x128xf32>,
    %c0_i32_146 = arith.constant 0 : i32
    %469 = arith.cmpi eq, %arg1, %c0_i32_146 : i32
    %470 = arith.extui %469 : i1 to i32
    %c0_i32_147 = arith.constant 0 : i32
    %471 = arith.cmpi ne, %470, %c0_i32_147 : i32
    scf.if %471 {
      %c0_148 = arith.constant 0 : index
      %c0_149 = arith.constant 0 : index
      %472 = vector.load %arg8[%c0_148, %c0_149] : memref<8x128xf32, #tpu.memory_space<vmem>>, vector<8x128xf32>
      %c0_150 = arith.constant 0 : index
      %c0_151 = arith.constant 0 : index
      %473 = vector.load %arg5[%c0_150, %c0_151] : memref<8x1xi32, #tpu.memory_space<vmem>>, vector<8x1xi32>
      %c2_i32_152 = arith.constant 2 : i32
      %474 = vector.broadcast %c2_i32_152 : i32 to vector<8x1xi32>
      %475 = arith.muli %474, %473 : vector<8x1xi32>
      %c1_i32_153 = arith.constant 1 : i32
      %476 = vector.broadcast %c1_i32_153 : i32 to vector<8x1xi32>
      %477 = arith.subi %475, %476 : vector<8x1xi32>
      %478 = vector.broadcast %477 : vector<8x1xi32> to vector<8x128xi32>
      %479 = arith.cmpi eq, %109, %478 : vector<8x128xi32>
      %c2_i32_154 = arith.constant 2 : i32
      %480 = vector.broadcast %c2_i32_154 : i32 to vector<8x1xi32>
      %481 = arith.muli %480, %473 : vector<8x1xi32>
      %482 = vector.broadcast %481 : vector<8x1xi32> to vector<8x128xi32>
      %483 = arith.cmpi eq, %109, %482 : vector<8x128xi32>
      %484 = arith.ori %479, %483 : vector<8x128xi1>
      %cst_155 = arith.constant -1.000000e+09 : f32
      %485 = vector.broadcast %cst_155 : f32 to vector<8x128xf32>
      %486 = arith.select %484, %472, %485 : vector<8x128xi1>, vector<8x128xf32>
      %cst_156 = arith.constant dense<0xFF800000> : vector<8xf32>
      %487 = vector.multi_reduction <maximumf>, %486, %cst_156 [1] : vector<8x128xf32> to vector<8xf32>
      %488 = vector.shape_cast %487 : vector<8xf32> to vector<8x1xf32>
      %cst_157 = arith.constant -5.000000e+08 : f32
      %489 = vector.broadcast %cst_157 : f32 to vector<8x1xf32>
      %490 = arith.cmpf ogt, %488, %489 : vector<8x1xf32>
      %cst_158 = arith.constant 0.000000e+00 : f32
      %491 = vector.broadcast %cst_158 : f32 to vector<8x1xf32>
      %492 = arith.select %490, %488, %491 : vector<8x1xi1>, vector<8x1xf32>
      %493 = vector.broadcast %492 : vector<8x1xf32> to vector<8x128xf32>
      %494 = arith.subf %486, %493 : vector<8x128xf32>
      %495 = math.exp %494 : vector<8x128xf32>
      %cst_159 = arith.constant dense<0.000000e+00> : vector<8xf32>
      %496 = vector.multi_reduction <add>, %495, %cst_159 [1] : vector<8x128xf32> to vector<8xf32>
      %497 = vector.shape_cast %496 : vector<8xf32> to vector<8x1xf32>
      %498 = math.log %497 : vector<8x1xf32>
      %499 = arith.addf %492, %498 : vector<8x1xf32>
      %cst_160 = arith.constant 0.000000e+00 : f32
      %500 = vector.broadcast %cst_160 : f32 to vector<8x1xf32>
      %501 = arith.subf %500, %499 : vector<8x1xf32>
      %c0_161 = arith.constant 0 : index
      %c0_162 = arith.constant 0 : index
      %502 = vector.load %arg6[%c0_161, %c0_162] : memref<8x1xf32, #tpu.memory_space<vmem>>, vector<8x1xf32>
      tpu.vector_store %arg6[%c0_161, %c0_162], %501 {strides = array<i32>} : memref<8x1xf32, #tpu.memory_space<vmem>>, vector<8x1xf32>,
    } else {
    }
    return
  }
  func.func @transform_0(%arg0: i32, %arg1: i32) -> (i32, i32, i32) {
    %c0_i32 = arith.constant 0 : i32
    %c0_i32_0 = arith.constant 0 : i32
    return %arg1, %arg0, %c0_i32 : i32, i32, i32
  }
  func.func @transform_1(%arg0: i32, %arg1: i32) -> (i32, i32) {
    %c0_i32 = arith.constant 0 : i32
    %c0_i32_0 = arith.constant 0 : i32
    return %arg0, %c0_i32 : i32, i32
  }
  func.func @transform_2(%arg0: i32, %arg1: i32) -> (i32, i32) {
    %c0_i32 = arith.constant 0 : i32
    %c0_i32_0 = arith.constant 0 : i32
    return %arg0, %c0_i32 : i32, i32
  }
  func.func @transform_3(%arg0: i32, %arg1: i32) -> (i32, i32) {
    %c0_i32 = arith.constant 0 : i32
    %c0_i32_0 = arith.constant 0 : i32
    return %arg0, %c0_i32 : i32, i32
  }
  func.func @transform_4(%arg0: i32, %arg1: i32) -> (i32, i32) {
    %c0_i32 = arith.constant 0 : i32
    %c0_i32_0 = arith.constant 0 : i32
    return %arg0, %c0_i32 : i32, i32
  }
}

</mosaic_0001>

<bundles_post_ra>
// kernel: tpu_custom_call.1
= control target key start
LH: loop header
LB: loop body
LE: loop exit
PB: predicated region body
PF: predicated region fallthrough
CT: control target
= control target key end

     0   :  { %9 = vsyncpa [#allocation5], 0  ;;  %s1263_s18 = smov [#allocation4]   ;;  %s1264_s20 = smov 128   ;;  %s1655_s0 = inlined_call_operand.hbm [shape: f32[8,8,16], index: 0, kind: input, shape index: {}]   ;;  %s1656_s1 = inlined_call_operand.vmem [shape: s32[8,128], index: 1, kind: input, shape index: {}]   ;;  %s1657_s2 = inlined_call_operand.vmem [shape: s32[8,1], index: 2, kind: input, shape index: {}]   ;;  %s1658_s3 = inlined_call_operand.vmem [shape: s32[8,1], index: 3, kind: input, shape index: {}]   ;;  %s1659_s4 = inlined_call_operand.vmem [shape: f32[8,1], index: 4, kind: output, shape index: {}]  }
   0x1   :  { %s14_s17 = sshll.u32 %s1655_s0, 4  ;;  %s16_s19 = sshll.u32 %s1263_s18, 4  ;;  %s15_s17 = int_to_ptr.hbm [resolvable:$true] %s14_s17  ;;  %s17_s19 = int_to_ptr.vmem [resolvable:$true] %s16_s19 }
   0x2   :  { %s1265_s21 = smov 8  }
   0x3   :  { %22 = dma.hbm_to_vmem [thread:$0]  %s15_s17, 1024, %s17_s19, [#allocation5], %s1264_s20, %s1264_s20, %s1265_s21  }
   0x4   :  { %1261 = dma.done.wait [#allocation5], 1024  }
   0x5   :  { %1262 = vsyncadd [#allocation5], 4294966272  ;;  %vm42_vm0 = vcmask 130048   ;;  %v38_v0 = vld [vmem:[#allocation4 + $0x20] sm:$0xff]  ;;  %v36_v1 = vld [vmem:[#allocation4 + $0x10] sm:$0xff]  ;;  %v1266_v57 = vmov 0   ;;  %v140_v60 = vlaneseq }
   0x6   :  { %v34_v2 = vld [vmem:[#allocation4] sm:$0xff]  ;;  %v55_v3 = vsel %vm42_vm0, %v38_v0, -inf  ;;  %v49_v4 = vsel %vm42_vm0, %v36_v1, -inf  ;;  %v39_v6 = vld [vmem:[#allocation4 + $0x28] sm:$0xff]  ;;  %v37_v7 = vld [vmem:[#allocation4 + $0x18] sm:$0xff]  ;;  %1142 = vset.pattern.permute.xlu1 %v1266_v57  ;;  %1143 = vset.pattern.permute.xlu0 %v1266_v57  ;;  %vm159_vm15 = vcmask 1041409  }
   0x7   :  { %v43_v5 = vsel %vm42_vm0, %v34_v2, -inf  ;;  %56 = vmax.xlane.f32.xlu2 %v55_v3  ;;  %50 = vmax.xlane.f32.xlu1 %v49_v4  ;;  %v35_v8 = vld [vmem:[#allocation4 + $0x8] sm:$0xff]  ;;  %v58_v9 = vsel %vm42_vm0, %v39_v6, -inf  ;;  %v52_v10 = vsel %vm42_vm0, %v37_v7, -inf  ;;  %v41_v12 = vld [vmem:[#allocation4 + $0x38] sm:$0xff]  ;;  %v40_v13 = vld [vmem:[#allocation4 + $0x30] sm:$0xff] }
   0x8   :  { %44 = vmax.xlane.f32.xlu0 %v43_v5  ;;  %v46_v11 = vsel %vm42_vm0, %v35_v8, -inf  ;;  %v64_v14 = vsel %vm42_vm0, %v41_v12, -inf  ;;  %v61_v15 = vsel %vm42_vm0, %v40_v13, -inf  ;;  %v1341_v56 = vld [vmem:[%s1657_s2] sm:$0xff]  ;;  %1144 = vset.pattern.permute.xlu2 %v1266_v57  ;;  %s1269_s24 = smov 1  }
   0x9   :  { %vm1126_vm1 = vcmp.gt.s32.totalorder %v1341_v56, 0  ;;  %vm1127_vm2 = vcmp.gt.s32.totalorder %v1341_v56, 1  ;;  %vm1128_vm3 = vcmp.gt.s32.totalorder %v1341_v56, 2  ;;  %vm1129_vm12 = vcmp.gt.s32.totalorder %v1341_v56, 3 }
   0xa   :  { %v741_v58 = vsel %vm1126_vm1, 1, %v1266_v57  ;;  %v784_v59 = vsel %vm1127_vm2, 1, %v1266_v57  ;;  %v827_v63 = vsel %vm1128_vm3, 1, %v1266_v57  ;;  %vm162_vm1 = vcmask 1042434  }
   0xf   :  { %59 = vmax.xlane.f32.xlu2 %v58_v9  ;;  %53 = vmax.xlane.f32.xlu1 %v52_v10 }
  0x10   :  { %47 = vmax.xlane.f32.xlu0 %v46_v11 }
  0x17   :  { %65 = vmax.xlane.f32.xlu1 %v64_v14 }
  0x18   :  { %62 = vmax.xlane.f32.xlu0 %v61_v15 }
  0x7a   :  { %v57_v16 = vpop.xlane.xlu2 %56  ;;  %v51_v17 = vpop.xlane.xlu1 %50 }
  0x7b   :  { %v1306_v18 = vsub.f32 %v36_v1, %v51_v17  ;;  %v45_v19 = vpop.xlane.xlu0 %44  ;;  %v1321_v34 = vsub.f32 %v38_v0, %v57_v16  ;;  %v1353_v0 = vshrl.u32 %v140_v60, 7  ;;  %v1358_v1 = vld [vmem:[%s1656_s1] sm:$0xff]  ;;  %s1268_s1 = smov 2  }
  0x7c   :  { %v1308_v20 = vsub.f32 %v34_v2, %v45_v19  ;;  %v143_v3 = vperm.slane %v1358_v1, 0  ;;  %v224_v4 = vperm.slane %v1358_v1, 1  ;;  %v290_v5 = vperm.slane %v1358_v1, 2 }
  0x7d   :  { %v79_v21 = vmul.f32 1.442695, %v1306_v18  ;;  %v83_v38 = vmul.f32 1.442695, %v1321_v34  ;;  %v1361_v2 = vadd.s32 8, %v1353_v0  ;;  %v554_v15 = vperm.slane %v1358_v1, 6 }
  0x7e   :  { %v75_v22 = vmul.f32 1.442695, %v1308_v20  ;;  %vm144_vm6 = vcmp.eq.s32.totalorder %v1353_v0, %v143_v3  ;;  %vm225_vm7 = vcmp.eq.s32.totalorder %v1353_v0, %v224_v4  ;;  %vm291_vm10 = vcmp.eq.s32.totalorder %v1353_v0, %v290_v5 }
  0x7f   :  { %1145 = vpow2.f32 %v79_v21  ;;  %vm145_vm4 = vcmp.eq.s32.totalorder %v1361_v2, %v143_v3  ;;  %vm226_vm5 = vcmp.eq.s32.totalorder %v1361_v2, %v224_v4  ;;  %vm292_vm8 = vcmp.eq.s32.totalorder %v1361_v2, %v290_v5 }
  0x80   :  { %1147 = vpow2.f32 %v75_v22  ;;  %v620_v16 = vperm.slane %v1358_v1, 7  ;;  %v422_v19 = vperm.slane %v1358_v1, 4  ;;  %vm556_vm13 = vcmp.eq.s32.totalorder %v1361_v2, %v554_v15 }
  0x81   :  { %vm555_vm2 = vcmp.eq.s32.totalorder %v1353_v0, %v554_v15 }
  0x82   :  { %v60_v23 = vpop.xlane.xlu2 %59  ;;  %v54_v24 = vpop.xlane.xlu1 %53  ;;  %vm622_vm14 = vcmp.eq.s32.totalorder %v1361_v2, %v620_v16  ;;  %vm621_vm3 = vcmp.eq.s32.totalorder %v1353_v0, %v620_v16 }
  0x83   :  { %v1312_v25 = vsub.f32 %v39_v6, %v60_v23  ;;  %v1314_v26 = vsub.f32 %v37_v7, %v54_v24  ;;  %v48_v27 = vpop.xlane.xlu0 %47  ;;  %v356_v6 = vperm.slane %v1358_v1, 3  ;;  %v1267_v7 = vmov 1.0  }
  0x84   :  { %v1316_v28 = vsub.f32 %v35_v8, %v48_v27  ;;  %1088 = vmatpush.msk.msra.mxu0 %vm145_vm4, %v1267_v7  ;;  %1093 = vmatpush.msk.msra.mxu1 %vm226_vm5, %v1267_v7  ;;  %vm424_vm4 = vcmp.eq.s32.totalorder %v1361_v2, %v422_v19  ;;  %vm1404_vm5 = vcmp.eq.s32.totalorder %v1353_v0, %v422_v19 }
  0x85   :  { %v85_v29 = vmul.f32 1.442695, %v1312_v25  ;;  %v81_v30 = vmul.f32 1.442695, %v1314_v26  ;;  %v1146_v31 = vpop.eup %1145  ;;  %vm358_vm9 = vcmp.eq.s32.totalorder %v1361_v2, %v356_v6  ;;  %1098 = vmatpush.msk.msra.mxu2 %vm292_vm8, %v1267_v7  ;;  %vm357_vm11 = vcmp.eq.s32.totalorder %v1353_v0, %v356_v6 }
  0x86   :  { %v77_v32 = vmul.f32 1.442695, %v1316_v28  ;;  %v1148_v33 = vpop.eup %1147  ;;  %v97_v35 = vsel %vm42_vm0, %v1146_v31, 0.0  ;;  %1103 = vmatpush.msk.msra.mxu3 %vm358_vm9, %v1267_v7  ;;  %1089 = vmatpush.msk.msra.mxu0 %vm144_vm6, %v1267_v7  ;;  %vm165_vm6 = vcmask 1043459   ;;  %vm168_vm9 = vcmask 1044484  }
  0x87   :  { %1149 = vpow2.f32 %v85_v29  ;;  %98 = vadd.xlane.f32.xlu1 %v97_v35  ;;  %v91_v36 = vsel %vm42_vm0, %v1148_v33, 0.0  ;;  %1094 = vmatpush.msk.msra.mxu1 %vm225_vm7, %v1267_v7 }
  0x88   :  { %1151 = vpow2.f32 %v81_v30  ;;  %92 = vadd.xlane.f32.xlu2 %v91_v36  ;;  %1099 = vmatpush.msk.msra.mxu2 %vm291_vm10, %v1267_v7  ;;  %vm171_vm10 = vcmask 1045509  }
  0x89   :  { %1153 = vpow2.f32 %v77_v32  ;;  %1104 = vmatpush.msk.msra.mxu3 %vm357_vm11, %v1267_v7  ;;  %1108 = vmatpush.msk.msrb.mxu0 %vm424_vm4, %v1267_v7  ;;  %vm174_vm11 = vcmask 1046534   ;;  %vm692_vm4 = vcmp.ne.s32.totalorder %v1358_v1, 0 }
  0x8a   :  { %v66_v37 = vpop.xlane.xlu1 %65  ;;  %1155 = vpow2.f32 %v83_v38  ;;  %1118 = vmatpush.msk.msrb.mxu2 %vm556_vm13, %v1267_v7  ;;  %vm1130_vm13 = vcmp.gt.s32.totalorder %v1341_v56, 4 }
  0x8b   :  { %v63_v39 = vpop.xlane.xlu0 %62  ;;  %v1328_v42 = vsub.f32 %v41_v12, %v66_v37  ;;  %1123 = vmatpush.msk.msrb.mxu3 %vm622_vm14, %v1267_v7  ;;  %1109 = vmatpush.msk.msrb.mxu0 %vm1404_vm5, %v1267_v7  ;;  %vm1131_vm14 = vcmp.gt.s32.totalorder %v1341_v56, 5 }
  0x8c   :  { %v1326_v40 = vsub.f32 %v40_v13, %v63_v39  ;;  %1119 = vmatpush.msk.msrb.mxu2 %vm555_vm2, %v1267_v7  ;;  %vm1132_vm2 = vcmp.gt.s32.totalorder %v1341_v56, 6 }
  0x8d   :  { %v1150_v41 = vpop.eup %1149  ;;  %v89_v49 = vmul.f32 1.442695, %v1328_v42  ;;  %1124 = vmatpush.msk.msrb.mxu3 %vm621_vm3, %v1267_v7  ;;  %vm1133_vm3 = vcmp.gt.s32.totalorder %v1341_v56, 7 }
  0x8e   :  { %v1152_v43 = vpop.eup %1151  ;;  %v87_v44 = vmul.f32 1.442695, %v1326_v40  ;;  %v106_v45 = vsel %vm42_vm0, %v1150_v41, 0.0 }
  0x8f   :  { %v1154_v46 = vpop.eup %1153  ;;  %v100_v47 = vsel %vm42_vm0, %v1152_v43, 0.0  ;;  %107 = vadd.xlane.f32.xlu1 %v106_v45 }
  0x90   :  { %1157 = vpow2.f32 %v87_v44  ;;  %v94_v48 = vsel %vm42_vm0, %v1154_v46, 0.0  ;;  %101 = vadd.xlane.f32.xlu2 %v100_v47  ;;  %v1156_v50 = vpop.eup %1155 }
  0x91   :  { %95 = vadd.xlane.f32.xlu0 %v94_v48  ;;  %1159 = vpow2.f32 %v89_v49  ;;  %v103_v53 = vsel %vm42_vm0, %v1156_v50, 0.0 }
  0x96   :  { %v1158_v51 = vpop.eup %1157 }
  0x97   :  { %v109_v52 = vsel %vm42_vm0, %v1158_v51, 0.0  ;;  %v1160_v54 = vpop.eup %1159 }
  0x98   :  { %110 = vadd.xlane.f32.xlu2 %v109_v52  ;;  %v112_v55 = vsel %vm42_vm0, %v1160_v54, 0.0 }
  0x99   :  { %104 = vadd.xlane.f32.xlu0 %v103_v53 }
  0xa1   :  { %113 = vadd.xlane.f32.xlu0 %v112_v55 }
  0xa8   :  { %743 = vperm.xlu1 %1142, %v741_v58  }
  0xb0   :  { %786 = vperm.xlu1 %1142, %v784_v59   ;;  %688 = vrot.lane.b32.xlu2 %v1358_v1, %s1268_s1 }
  0xb8   :  { %829 = vperm.xlu1 %1142, %v827_v63  }
  0xfa   :  { %v99_v61 = vpop.xlane.xlu1 %98 }
  0xfb   :  { %1161 = vlog2.f32 %v99_v61  ;;  %v93_v62 = vpop.xlane.xlu2 %92 }
  0xfc   :  { %1163 = vlog2.f32 %v93_v62 }
 0x101   :  { %v1162_v8 = vpop.eup %1161 }
 0x102   :  { %v1164_v9 = vpop.eup %1163  ;;  %v120_v10 = vmul.f32 0.6931472, %v1162_v8  ;;  %v108_v11 = vpop.xlane.xlu1 %107 }
 0x103   :  { %v116_v12 = vmul.f32 0.6931472, %v1164_v9  ;;  %1165 = vlog2.f32 %v108_v11  ;;  %v102_v13 = vpop.xlane.xlu2 %101 }
 0x104   :  { %v96_v14 = vpop.xlane.xlu0 %95  ;;  %v1386_v17 = vsub.f32 %v1306_v18, %v120_v10  ;;  %1167 = vlog2.f32 %v102_v13  ;;  %v870_v18 = vsel %vm1129_vm12, 1, %v1266_v57  ;;  %vm177_vm12 = vcmask 1047559  }
 0x105   :  { %v1391_v21 = vsub.f32 %v1308_v20, %v116_v12  ;;  %1169 = vlog2.f32 %v96_v14  ;;  %872 = vperm.xlu1 %1142, %v870_v18   ;;  %v488_v20 = vperm.slane %v1358_v1, 5 }
 0x106   :  { %v161_v24 = vrot.slane %v1386_v17, 6  ;;  %v233_v29 = vrot.slane %v1386_v17, 7  ;;  %v366_v30 = vrot.slane %v1386_v17, 1  ;;  %v432_v44 = vrot.slane %v1386_v17, 2 }
 0x107   :  { %v231_v27 = vrot.slane %v1391_v21, 1  ;;  %v297_v33 = vrot.slane %v1391_v21, 2  ;;  %vm490_vm7 = vcmp.eq.s32.totalorder %v1361_v2, %v488_v20  ;;  %vm1417_vm8 = vcmp.eq.s32.totalorder %v1353_v0, %v488_v20 }
 0x108   :  { %v363_v41 = vrot.slane %v1391_v21, 3  ;;  %1113 = vmatpush.msk.msrb.mxu1 %vm490_vm7, %v1267_v7  ;;  %v429_v43 = vrot.slane %v1391_v21, 4  ;;  %v495_v47 = vrot.slane %v1391_v21, 5  ;;  %v498_v49 = vrot.slane %v1386_v17, 3 }
 0x109   :  { %v1166_v23 = vpop.eup %1165  ;;  %v561_v50 = vrot.slane %v1391_v21, 6  ;;  %v627_v52 = vrot.slane %v1391_v21, 7  ;;  %v630_v53 = vrot.slane %v1386_v17, 5 }
 0x10a   :  { %v1168_v31 = vpop.eup %1167  ;;  %v126_v32 = vmul.f32 0.6931472, %v1166_v23  ;;  %1114 = vmatpush.msk.msrb.mxu1 %vm1417_vm8, %v1267_v7 }
 0x10b   :  { %v1170_v36 = vpop.eup %1169  ;;  %v122_v37 = vmul.f32 0.6931472, %v1168_v31  ;;  %v111_v38 = vpop.xlane.xlu2 %110 }
 0x10c   :  { %v105_v39 = vpop.xlane.xlu0 %104  ;;  %v1429_v45 = vsub.f32 %v1312_v25, %v126_v32  ;;  %v118_v46 = vmul.f32 0.6931472, %v1170_v36  ;;  %1171 = vlog2.f32 %v111_v38  ;;  %v564_v25 = vrot.slane %v1386_v17, 4 }
 0x10d   :  { %v1433_v48 = vsub.f32 %v1314_v26, %v122_v37  ;;  %1173 = vlog2.f32 %v105_v39 }
 0x10e   :  { %v1441_v51 = vsub.f32 %v1316_v28, %v118_v46  ;;  %v170_v54 = vrot.slane %v1429_v45, 3  ;;  %v239_v55 = vrot.slane %v1429_v45, 4  ;;  %v305_v58 = vrot.slane %v1429_v45, 5 }
 0x10f   :  { %v164_v26 = vrot.slane %v1433_v48, 5  ;;  %v235_v63 = vrot.slane %v1433_v48, 6  ;;  %v301_v0 = vrot.slane %v1433_v48, 7  ;;  %v371_v2 = vrot.slane %v1429_v45, 6 }
 0x110   :  { %v158_v59 = vrot.slane %v1441_v51, 7  ;;  %v232_v28 = vsel %vm159_vm15, %v1441_v51, %v231_v27  ;;  %v298_v61 = vrot.slane %v1441_v51, 1  ;;  %v364_v62 = vrot.slane %v1441_v51, 2 }
 0x111   :  { %v430_v3 = vrot.slane %v1441_v51, 3  ;;  %v234_v6 = vsel %vm162_vm1, %v233_v29, %v232_v28  ;;  %v434_v16 = vrot.slane %v1433_v48, 1  ;;  %v437_v19 = vrot.slane %v1429_v45, 7 }
 0x112   :  { %v1172_v4 = vpop.eup %1171  ;;  %v160_v5 = vsel %vm159_vm15, %v158_v59, %v1391_v21  ;;  %v299_v7 = vsel %vm159_vm15, %v298_v61, %v297_v33  ;;  %v365_v8 = vsel %vm159_vm15, %v364_v62, %v363_v41  ;;  %v236_v20 = vsel %vm165_vm6, %v235_v63, %v234_v6 }
 0x113   :  { %v1174_v9 = vpop.eup %1173  ;;  %v128_v10 = vmul.f32 0.6931472, %v1172_v4  ;;  %v163_v12 = vsel %vm162_vm1, %v161_v24, %v160_v5  ;;  %v300_v13 = vsel %vm162_vm1, %v1386_v17, %v299_v7  ;;  %v367_v14 = vsel %vm162_vm1, %v366_v30, %v365_v8 }
 0x114   :  { %v114_v11 = vpop.xlane.xlu0 %113  ;;  %v124_v15 = vmul.f32 0.6931472, %v1174_v9  ;;  %v431_v22 = vsel %vm159_vm15, %v430_v3, %v429_v43  ;;  %v496_v23 = vrot.slane %v1441_v51, 4  ;;  %v166_v27 = vsel %vm165_vm6, %v164_v26, %v163_v12 }
 0x115   :  { %1175 = vlog2.f32 %v114_v11  ;;  %v1471_v18 = vsub.f32 %v1326_v40, %v128_v10  ;;  %v302_v29 = vsel %vm165_vm6, %v301_v0, %v300_v13  ;;  %v368_v30 = vsel %vm165_vm6, %v1433_v48, %v367_v14 }
 0x116   :  { %v1477_v24 = vsub.f32 %v1321_v34, %v124_v15  ;;  %v433_v40 = vsel %vm162_vm1, %v432_v44, %v431_v22  ;;  %v500_v32 = vrot.slane %v1433_v48, 2  ;;  %v562_v33 = vrot.slane %v1441_v51, 5 }
 0x117   :  { %v173_v31 = vrot.slane %v1471_v18, 2  ;;  %v241_v38 = vrot.slane %v1471_v18, 3  ;;  %v307_v39 = vrot.slane %v1471_v18, 4  ;;  %v373_v41 = vrot.slane %v1471_v18, 5 }
 0x118   :  { %v167_v35 = vrot.slane %v1477_v24, 4  ;;  %v237_v34 = vrot.slane %v1477_v24, 5  ;;  %v303_v36 = vrot.slane %v1477_v24, 6  ;;  %v369_v37 = vrot.slane %v1477_v24, 7 }
 0x119   :  { %v497_v43 = vsel %vm159_vm15, %v496_v23, %v495_v47  ;;  %v435_v0 = vsel %vm165_vm6, %v434_v16, %v433_v40  ;;  %v439_v4 = vrot.slane %v1471_v18, 6  ;;  %v502_v5 = vrot.slane %v1477_v24, 1 }
 0x11a   :  { %v169_v46 = vsel %vm168_vm9, %v167_v35, %v166_v27  ;;  %v238_v26 = vsel %vm168_vm9, %v237_v34, %v236_v20  ;;  %v304_v59 = vsel %vm168_vm9, %v303_v36, %v302_v29  ;;  %v370_v28 = vsel %vm168_vm9, %v369_v37, %v368_v30 }
 0x11b   :  { %v1176_v44 = vpop.eup %1175  ;;  %v172_v62 = vsel %vm171_vm10, %v170_v54, %v169_v46  ;;  %v240_v63 = vsel %vm171_vm10, %v239_v55, %v238_v26  ;;  %v306_v3 = vsel %vm171_vm10, %v305_v58, %v304_v59  ;;  %v372_v7 = vsel %vm171_vm10, %v371_v2, %v370_v28 }
 0x11c   :  { %v130_v61 = vmul.f32 0.6931472, %v1176_v44  ;;  %v175_v47 = vsel %vm174_vm11, %v173_v31, %v172_v62  ;;  %v436_v54 = vsel %vm168_vm9, %v1477_v24, %v435_v0  ;;  %v499_v55 = vsel %vm162_vm1, %v498_v49, %v497_v43 }
 0x11d   :  { %v242_v8 = vsel %vm174_vm11, %v241_v38, %v240_v63  ;;  %v438_v58 = vsel %vm171_vm10, %v437_v19, %v436_v54  ;;  %v501_v9 = vsel %vm165_vm6, %v500_v32, %v499_v55  ;;  %v308_v49 = vsel %vm174_vm11, %v307_v39, %v306_v3 }
 0x11e   :  { %v1508_v6 = vsub.f32 %v1328_v42, %v130_v61  ;;  %v563_v42 = vsel %vm159_vm15, %v562_v33, %v561_v50  ;;  %v374_v13 = vsel %vm174_vm11, %v373_v41, %v372_v7  ;;  %v503_v15 = vsel %vm168_vm9, %v502_v5, %v501_v9 }
 0x11f   :  { %v440_v22 = vsel %vm174_vm11, %v439_v4, %v438_v58  ;;  %v565_v23 = vsel %vm162_vm1, %v564_v25, %v563_v42  ;;  %v566_v27 = vrot.slane %v1433_v48, 3  ;;  %v505_v30 = vrot.slane %v1471_v18, 7 }
 0x120   :  { %v176_v10 = vrot.slane %v1508_v6, 1  ;;  %v243_v2 = vrot.slane %v1508_v6, 2  ;;  %v309_v11 = vrot.slane %v1508_v6, 3  ;;  %v375_v12 = vrot.slane %v1508_v6, 4 }
 0x121   :  { %v441_v14 = vrot.slane %v1508_v6, 5  ;;  %v507_v31 = vrot.slane %v1508_v6, 6  ;;  %v568_v40 = vrot.slane %v1477_v24, 2  ;;  %v504_v32 = vsel %vm171_vm10, %v1429_v45, %v503_v15 }
 0x122   :  { %v178_v16 = vsel %vm177_vm12, %v176_v10, %v175_v47  ;;  %v244_v50 = vsel %vm177_vm12, %v243_v2, %v242_v8  ;;  %v310_v19 = vsel %vm177_vm12, %v309_v11, %v308_v49  ;;  %v376_v20 = vsel %vm177_vm12, %v375_v12, %v374_v13 }
 0x123   :  { %1090 = vmatmul.msk.f32.vlgmr.msra.gmra.mxu0 %vm42_vm0, %v178_v16  ;;  %1095 = vmatmul.msk.f32.vlgmr.msra.gmra.mxu1 %vm42_vm0, %v244_v50  ;;  %v442_v29 = vsel %vm177_vm12, %v441_v14, %v440_v22  ;;  %v567_v25 = vsel %vm165_vm6, %v566_v27, %v565_v23  ;;  %v570_v33 = vrot.slane %v1429_v45, 1  ;;  %v628_v35 = vrot.slane %v1441_v51, 6 }
 0x124   :  { %1100 = vmatmul.msk.f32.vlgmr.msra.gmra.mxu2 %vm42_vm0, %v310_v19  ;;  %1105 = vmatmul.msk.f32.vlgmr.msra.gmra.mxu3 %vm42_vm0, %v376_v20  ;;  %v569_v34 = vsel %vm168_vm9, %v568_v40, %v567_v25  ;;  %v573_v36 = vrot.slane %v1508_v6, 7  ;;  %v632_v37 = vrot.slane %v1433_v48, 4  ;;  %v634_v38 = vrot.slane %v1477_v24, 3 }
 0x125   :  { %v571_v39 = vsel %vm171_vm10, %v570_v33, %v569_v34  ;;  %v629_v41 = vsel %vm159_vm15, %v628_v35, %v627_v52  ;;  %v913_v43 = vsel %vm1130_vm13, 1, %v1266_v57  ;;  %v956_v51 = vsel %vm1131_vm14, 1, %v1266_v57 }
 0x126   :  { %v506_v44 = vsel %vm174_vm11, %v505_v30, %v504_v32  ;;  %v631_v48 = vsel %vm162_vm1, %v630_v53, %v629_v41  ;;  %915 = vperm.xlu1 %1142, %v913_v43   ;;  %v636_v52 = vrot.slane %v1429_v45, 2  ;;  %v999_v24 = vsel %vm1132_vm2, 1, %v1266_v57 }
 0x127   :  { %v633_v21 = vsel %vm165_vm6, %v632_v37, %v631_v48  ;;  %v1042_v46 = vsel %vm1133_vm3, 1, %v1266_v57  ;;  %v508_v26 = vsel %vm177_vm12, %v507_v31, %v506_v44  ;;  %v572_v17 = vsel %vm174_vm11, %v1471_v18, %v571_v39 }
 0x128   :  { %v635_v53 = vsel %vm168_vm9, %v634_v38, %v633_v21  ;;  %v638_v59 = vrot.slane %v1471_v18, 1  ;;  %v574_v56 = vsel %vm177_vm12, %v573_v36, %v572_v17  ;;  %vm690_vm1 = vcmask 15360  }
 0x129   :  { %v637_v45 = vsel %vm171_vm10, %v636_v52, %v635_v53 }
 0x12a   :  { %v639_v57 = vsel %vm174_vm11, %v638_v59, %v637_v45 }
 0x12b   :  { %1110 = vmatmul.msk.f32.vlgmr.msrb.gmra.mxu0 %vm42_vm0, %v442_v29  ;;  %1115 = vmatmul.msk.f32.vlgmr.msrb.gmra.mxu1 %vm42_vm0, %v508_v26  ;;  %v640_v28 = vsel %vm177_vm12, %v1508_v6, %v639_v57 }
 0x12c   :  { %1120 = vmatmul.msk.f32.vlgmr.msrb.gmra.mxu2 %vm42_vm0, %v574_v56  ;;  %1125 = vmatmul.msk.f32.vlgmr.msrb.gmra.mxu3 %vm42_vm0, %v640_v28 }
 0x12e   :  { %958 = vperm.xlu1 %1142, %v956_v51  }
 0x136   :  { %1001 = vperm.xlu1 %1142, %v999_v24  }
 0x13e   :  { %1044 = vperm.xlu1 %1142, %v1042_v46  }
 0x1a0   :  { %v198_v18 = vpop.f32.mrf.mxu0  ;;  %v264_v61 = vpop.f32.mrf.mxu1 }
 0x1a1   :  { %v202_v62 = vrot.slane %v198_v18, 1  ;;  %v203_v63 = vrot.slane %v198_v18, 2  ;;  %v204_v0 = vrot.slane %v198_v18, 3  ;;  %216 = vst [vmem:[#allocation2] sm:$0x1] %v198_v18  ;;  %v205_v47 = vrot.slane %v198_v18, 4 }
 0x1a2   :  { %282 = vst [vmem:[#allocation2 + $0x1] sm:$0x1] %v264_v61  ;;  %v206_v3 = vrot.slane %v198_v18, 5  ;;  %v207_v4 = vrot.slane %v198_v18, 6  ;;  %v208_v5 = vrot.slane %v198_v18, 7  ;;  %v268_v6 = vrot.slane %v264_v61, 1 }
 0x1a3   :  { %217 = vst [vmem:[#allocation2 + $0x8] sm:$0x1] %v202_v62  ;;  %v269_v7 = vrot.slane %v264_v61, 2  ;;  %v270_v54 = vrot.slane %v264_v61, 3  ;;  %v271_v55 = vrot.slane %v264_v61, 4  ;;  %v272_v8 = vrot.slane %v264_v61, 5 }
 0x1a4   :  { %218 = vst [vmem:[#allocation2 + $0x10] sm:$0x1] %v203_v63  ;;  %v273_v58 = vrot.slane %v264_v61, 6  ;;  %v274_v42 = vrot.slane %v264_v61, 7  ;;  %v1594_v18 = vand.u32 127, %v140_v60  ;;  %v744_v63 = vpop.permute.xlu1 %743  ;;  %v689_v60 = vpop.permute.xlu2 %688 }
 0x1a5   :  { %219 = vst [vmem:[#allocation2 + $0x18] sm:$0x1] %v204_v0  ;;  %vm745_vm15 = vcmp.eq.s32.totalorder %v744_v63, 1 }
 0x1a6   :  { %220 = vst [vmem:[#allocation2 + $0x20] sm:$0x1] %v205_v47  ;;  %vm696_vm0 = vcmp.lt.s32.totalorder %v1594_v18, 2  ;;  %vm708_vm6 = vcmp.ge.s32.totalorder %v1594_v18, 2  ;;  %vm704_vm9 = vcmp.ge.s32.totalorder %v1594_v18, 1 }
 0x1a7   :  { %221 = vst [vmem:[#allocation2 + $0x28] sm:$0x1] %v206_v3  ;;  %v330_v9 = vpop.f32.mrf.mxu2  ;;  %v396_v14 = vpop.f32.mrf.mxu3 }
 0x1a8   :  { %222 = vst [vmem:[#allocation2 + $0x30] sm:$0x1] %v207_v4  ;;  %v334_v10 = vrot.slane %v330_v9, 1  ;;  %v335_v2 = vrot.slane %v330_v9, 2  ;;  %v336_v11 = vrot.slane %v330_v9, 3  ;;  %v337_v12 = vrot.slane %v330_v9, 4  ;;  %v462_v27 = vpop.f32.mrf.mxu0  ;;  %v528_v35 = vpop.f32.mrf.mxu1 }
 0x1a9   :  { %223 = vst [vmem:[#allocation2 + $0x38] sm:$0x1] %v208_v5  ;;  %v338_v49 = vrot.slane %v330_v9, 5  ;;  %v339_v13 = vrot.slane %v330_v9, 6  ;;  %v340_v15 = vrot.slane %v330_v9, 7  ;;  %v400_v16 = vrot.slane %v396_v14, 1 }
 0x1aa   :  { %283 = vst [vmem:[#allocation2 + $0x9] sm:$0x1] %v268_v6  ;;  %v401_v50 = vrot.slane %v396_v14, 2  ;;  %v402_v19 = vrot.slane %v396_v14, 3  ;;  %v403_v20 = vrot.slane %v396_v14, 4  ;;  %v404_v22 = vrot.slane %v396_v14, 5 }
 0x1ab   :  { %284 = vst [vmem:[#allocation2 + $0x11] sm:$0x1] %v269_v7  ;;  %v405_v23 = vrot.slane %v396_v14, 6  ;;  %v406_v29 = vrot.slane %v396_v14, 7  ;;  %v466_v30 = vrot.slane %v462_v27, 1  ;;  %v467_v31 = vrot.slane %v462_v27, 2 }
 0x1ac   :  { %285 = vst [vmem:[#allocation2 + $0x19] sm:$0x1] %v270_v54  ;;  %v468_v40 = vrot.slane %v462_v27, 3  ;;  %v469_v32 = vrot.slane %v462_v27, 4  ;;  %v470_v25 = vrot.slane %v462_v27, 5  ;;  %v471_v33 = vrot.slane %v462_v27, 6 }
 0x1ad   :  { %286 = vst [vmem:[#allocation2 + $0x21] sm:$0x1] %v271_v55  ;;  %v472_v34 = vrot.slane %v462_v27, 7  ;;  %v532_v36 = vrot.slane %v528_v35, 1  ;;  %v533_v37 = vrot.slane %v528_v35, 2  ;;  %v534_v38 = vrot.slane %v528_v35, 3 }
 0x1ae   :  { %287 = vst [vmem:[#allocation2 + $0x29] sm:$0x1] %v272_v8  ;;  %v535_v39 = vrot.slane %v528_v35, 4  ;;  %v536_v41 = vrot.slane %v528_v35, 5  ;;  %v537_v43 = vrot.slane %v528_v35, 6  ;;  %v538_v44 = vrot.slane %v528_v35, 7 }
 0x1af   :  { %288 = vst [vmem:[#allocation2 + $0x31] sm:$0x1] %v273_v58  ;;  %v594_v51 = vpop.f32.mrf.mxu2  ;;  %v660_v17 = vpop.f32.mrf.mxu3  ;;  %v691_v4 = vsel %vm690_vm1, 0, %v689_v60 }
 0x1b0   :  { %289 = vst [vmem:[#allocation2 + $0x39] sm:$0x1] %v274_v42  ;;  %v598_v48 = vrot.slane %v594_v51, 1  ;;  %v599_v21 = vrot.slane %v594_v51, 2  ;;  %v600_v52 = vrot.slane %v594_v51, 3  ;;  %v601_v24 = vrot.slane %v594_v51, 4 }
 0x1b1   :  { %348 = vst [vmem:[#allocation2 + $0x2] sm:$0x1] %v330_v9  ;;  %v602_v46 = vrot.slane %v594_v51, 5  ;;  %v603_v26 = vrot.slane %v594_v51, 6  ;;  %v604_v53 = vrot.slane %v594_v51, 7  ;;  %v664_v59 = vrot.slane %v660_v17, 1 }
 0x1b2   :  { %349 = vst [vmem:[#allocation2 + $0xa] sm:$0x1] %v334_v10  ;;  %v665_v56 = vrot.slane %v660_v17, 2  ;;  %v666_v45 = vrot.slane %v660_v17, 3  ;;  %v667_v57 = vrot.slane %v660_v17, 4  ;;  %v668_v28 = vrot.slane %v660_v17, 5 }
 0x1b3   :  { %350 = vst [vmem:[#allocation2 + $0x12] sm:$0x1] %v335_v2  ;;  %v669_v61 = vrot.slane %v660_v17, 6  ;;  %v670_v62 = vrot.slane %v660_v17, 7  ;;  %vm693_vm5 = vcmp.ne.s32.totalorder %v1358_v1, %v691_v4 }
 0x1b4   :  { %351 = vst [vmem:[#allocation2 + $0x1a] sm:$0x1] %v336_v11  ;;  %vm694_vm7 = vmand %vm692_vm4, %vm693_vm5 }
 0x1b5   :  { %352 = vst [vmem:[#allocation2 + $0x22] sm:$0x1] %v337_v12  ;;  %vm1602_vm8 = vmand %vm708_vm6, %vm694_vm7 }
 0x1b6   :  { %353 = vst [vmem:[#allocation2 + $0x2a] sm:$0x1] %v338_v49 }
 0x1b7   :  { %354 = vst [vmem:[#allocation2 + $0x32] sm:$0x1] %v339_v13 }
 0x1b8   :  { %355 = vst [vmem:[#allocation2 + $0x3a] sm:$0x1] %v340_v15 }
 0x1b9   :  { %414 = vst [vmem:[#allocation2 + $0x3] sm:$0x1] %v396_v14 }
 0x1ba   :  { %415 = vst [vmem:[#allocation2 + $0xb] sm:$0x1] %v400_v16 }
 0x1bb   :  { %416 = vst [vmem:[#allocation2 + $0x13] sm:$0x1] %v401_v50 }
 0x1bc   :  { %417 = vst [vmem:[#allocation2 + $0x1b] sm:$0x1] %v402_v19 }
 0x1bd   :  { %418 = vst [vmem:[#allocation2 + $0x23] sm:$0x1] %v403_v20 }
 0x1be   :  { %419 = vst [vmem:[#allocation2 + $0x2b] sm:$0x1] %v404_v22 }
 0x1bf   :  { %420 = vst [vmem:[#allocation2 + $0x33] sm:$0x1] %v405_v23 }
 0x1c0   :  { %421 = vst [vmem:[#allocation2 + $0x3b] sm:$0x1] %v406_v29 }
 0x1c1   :  { %480 = vst [vmem:[#allocation2 + $0x4] sm:$0x1] %v462_v27  ;;  %v787_v27 = vpop.permute.xlu1 %786 }
 0x1c2   :  { %481 = vst [vmem:[#allocation2 + $0xc] sm:$0x1] %v466_v30  ;;  %vm788_vm11 = vcmp.eq.s32.totalorder %v787_v27, 1 }
 0x1c3   :  { %482 = vst [vmem:[#allocation2 + $0x14] sm:$0x1] %v467_v31 }
 0x1c4   :  { %483 = vst [vmem:[#allocation2 + $0x1c] sm:$0x1] %v468_v40 }
 0x1c5   :  { %484 = vst [vmem:[#allocation2 + $0x24] sm:$0x1] %v469_v32 }
 0x1c6   :  { %485 = vst [vmem:[#allocation2 + $0x2c] sm:$0x1] %v470_v25 }
 0x1c7   :  { %486 = vst [vmem:[#allocation2 + $0x34] sm:$0x1] %v471_v33 }
 0x1c8   :  { %487 = vst [vmem:[#allocation2 + $0x3c] sm:$0x1] %v472_v34 }
 0x1c9   :  { %546 = vst [vmem:[#allocation2 + $0x5] sm:$0x1] %v528_v35 }
 0x1ca   :  { %547 = vst [vmem:[#allocation2 + $0xd] sm:$0x1] %v532_v36 }
 0x1cb   :  { %548 = vst [vmem:[#allocation2 + $0x15] sm:$0x1] %v533_v37 }
 0x1cc   :  { %549 = vst [vmem:[#allocation2 + $0x1d] sm:$0x1] %v534_v38 }
 0x1cd   :  { %550 = vst [vmem:[#allocation2 + $0x25] sm:$0x1] %v535_v39 }
 0x1ce   :  { %551 = vst [vmem:[#allocation2 + $0x2d] sm:$0x1] %v536_v41 }
 0x1cf   :  { %552 = vst [vmem:[#allocation2 + $0x35] sm:$0x1] %v537_v43 }
 0x1d0   :  { %553 = vst [vmem:[#allocation2 + $0x3d] sm:$0x1] %v538_v44 }
 0x1d1   :  { %612 = vst [vmem:[#allocation2 + $0x6] sm:$0x1] %v594_v51 }
 0x1d2   :  { %613 = vst [vmem:[#allocation2 + $0xe] sm:$0x1] %v598_v48 }
 0x1d3   :  { %614 = vst [vmem:[#allocation2 + $0x16] sm:$0x1] %v599_v21 }
 0x1d4   :  { %615 = vst [vmem:[#allocation2 + $0x1e] sm:$0x1] %v600_v52 }
 0x1d5   :  { %616 = vst [vmem:[#allocation2 + $0x26] sm:$0x1] %v601_v24 }
 0x1d6   :  { %617 = vst [vmem:[#allocation2 + $0x2e] sm:$0x1] %v602_v46 }
 0x1d7   :  { %618 = vst [vmem:[#allocation2 + $0x36] sm:$0x1] %v603_v26 }
 0x1d8   :  { %619 = vst [vmem:[#allocation2 + $0x3e] sm:$0x1] %v604_v53 }
 0x1d9   :  { %678 = vst [vmem:[#allocation2 + $0x7] sm:$0x1] %v660_v17 }
 0x1da   :  { %679 = vst [vmem:[#allocation2 + $0xf] sm:$0x1] %v664_v59  ;;  %v830_v59 = vpop.permute.xlu1 %829 }
 0x1db   :  { %680 = vst [vmem:[#allocation2 + $0x17] sm:$0x1] %v665_v56  ;;  %vm831_vm13 = vcmp.eq.s32.totalorder %v830_v59, 1 }
 0x1dc   :  { %681 = vst [vmem:[#allocation2 + $0x1f] sm:$0x1] %v666_v45 }
 0x1dd   :  { %682 = vst [vmem:[#allocation2 + $0x27] sm:$0x1] %v667_v57 }
 0x1de   :  { %683 = vst [vmem:[#allocation2 + $0x2f] sm:$0x1] %v668_v28 }
 0x1df   :  { %684 = vst [vmem:[#allocation2 + $0x37] sm:$0x1] %v669_v61 }
 0x1e0   :  { %685 = vst [vmem:[#allocation2 + $0x3f] sm:$0x1] %v670_v62  ;;  %v703_v0 = vld [vmem:[#allocation2] sm:$0xff] }
 0x1e1   :  { %v734_v47 = vsel %vm696_vm0, %v703_v0, -1e+09  ;;  %v749_v19 = vld [vmem:[#allocation2 + $0x8] sm:$0xff] }
 0x1e2   :  { %v746_v3 = vsel %vm745_vm15, %v734_v47, -1e+09  ;;  %v792_v46 = vld [vmem:[#allocation2 + $0x10] sm:$0xff] }
 0x1e3   :  { %753 = vrot.lane.b32.xlu2 %v746_v3, %s1268_s1  ;;  %750 = vrot.lane.b32.xlu0 %v746_v3, %s1269_s24 }
 0x23d   :  { %v754_v6 = vpop.permute.xlu2 %753 }
 0x23e   :  { %v755_v54 = vsel %vm1602_vm8, %v754_v6, -1e+09 }
 0x255   :  { %v751_v7 = vpop.permute.xlu0 %750 }
 0x256   :  { %v752_v55 = vsel %vm704_vm9, %v751_v7, -1e+09 }
 0x257   :  { %v756_v8 = vmax.f32 %v752_v55, %v755_v54 }
 0x259   :  { %v757_v58 = vmax.f32 %v746_v3, %v756_v8 }
 0x25b   :  { %vm758_vm10 = vcmp.gt.f32.partialorder %v757_v58, -5e+08 }
 0x25c   :  { %v759_v1 = vsel %vm758_vm10, %v757_v58, 0.0 }
 0x25d   :  { %v760_v9 = vsub.f32 %v746_v3, %v759_v1  ;;  %v763_v42 = vsub.f32 %v752_v55, %v759_v1  ;;  %v767_v10 = vsub.f32 %v755_v54, %v759_v1  ;;  %v771_v20 = vadd.f32 %v759_v1, %v749_v19 }
 0x25f   :  { %v761_v2 = vmul.f32 1.442695, %v760_v9  ;;  %v764_v11 = vmul.f32 1.442695, %v763_v42  ;;  %v768_v12 = vmul.f32 1.442695, %v767_v10 }
 0x260   :  { %v835_v10 = vld [vmem:[#allocation2 + $0x18] sm:$0xff] }
 0x261   :  { %1177 = vpow2.f32 %v761_v2 }
 0x262   :  { %1179 = vpow2.f32 %v764_v11 }
 0x263   :  { %1181 = vpow2.f32 %v768_v12 }
 0x267   :  { %v1178_v49 = vpop.eup %1177 }
 0x268   :  { %v1180_v13 = vpop.eup %1179 }
 0x269   :  { %v766_v14 = vadd.f32 %v1180_v13, %v1178_v49  ;;  %v1182_v15 = vpop.eup %1181  ;;  %v873_v49 = vpop.permute.xlu1 %872 }
 0x26a   :  { %vm874_vm2 = vcmp.eq.s32.totalorder %v873_v49, 1 }
 0x26b   :  { %v770_v16 = vadd.f32 %v1182_v15, %v766_v14 }
 0x26d   :  { %1183 = vlog2.f32 %v770_v16 }
 0x273   :  { %v1184_v50 = vpop.eup %1183 }
 0x274   :  { %v773_v22 = vmul.f32 0.6931472, %v1184_v50 }
 0x276   :  { %v774_v23 = vadd.f32 %v773_v22, %v771_v20 }
 0x278   :  { %v775_v29 = vmax.f32 %v774_v23, -1e+09 }
 0x27a   :  { %v789_v30 = vsel %vm788_vm11, %v775_v29, %v746_v3 }
 0x27b   :  { %796 = vrot.lane.b32.xlu2 %v789_v30, %s1268_s1  ;;  %793 = vrot.lane.b32.xlu0 %v789_v30, %s1269_s24 }
 0x2d5   :  { %v797_v31 = vpop.permute.xlu2 %796 }
 0x2d6   :  { %v798_v32 = vsel %vm1602_vm8, %v797_v31, -1e+09 }
 0x2ed   :  { %v794_v40 = vpop.permute.xlu0 %793 }
 0x2ee   :  { %v795_v25 = vsel %vm704_vm9, %v794_v40, -1e+09 }
 0x2ef   :  { %v799_v33 = vmax.f32 %v795_v25, %v798_v32 }
 0x2f1   :  { %v800_v35 = vmax.f32 %v789_v30, %v799_v33 }
 0x2f3   :  { %vm801_vm12 = vcmp.gt.f32.partialorder %v800_v35, -5e+08 }
 0x2f4   :  { %v802_v34 = vsel %vm801_vm12, %v800_v35, 0.0  ;;  %vm1079_vm12 = vcmask 7168  }
 0x2f5   :  { %v803_v36 = vsub.f32 %v789_v30, %v802_v34  ;;  %v806_v37 = vsub.f32 %v795_v25, %v802_v34  ;;  %v810_v38 = vsub.f32 %v798_v32, %v802_v34  ;;  %v814_v26 = vadd.f32 %v802_v34, %v792_v46 }
 0x2f7   :  { %v804_v39 = vmul.f32 1.442695, %v803_v36  ;;  %v807_v41 = vmul.f32 1.442695, %v806_v37  ;;  %v811_v43 = vmul.f32 1.442695, %v810_v38 }
 0x2f8   :  { %v878_v38 = vld [vmem:[#allocation2 + $0x20] sm:$0xff] }
 0x2f9   :  { %1185 = vpow2.f32 %v804_v39 }
 0x2fa   :  { %1187 = vpow2.f32 %v807_v41 }
 0x2fb   :  { %1189 = vpow2.f32 %v811_v43 }
 0x2ff   :  { %v1186_v51 = vpop.eup %1185 }
 0x300   :  { %v1188_v44 = vpop.eup %1187 }
 0x301   :  { %v809_v48 = vadd.f32 %v1188_v44, %v1186_v51  ;;  %v1190_v21 = vpop.eup %1189  ;;  %v916_v51 = vpop.permute.xlu1 %915 }
 0x302   :  { %vm917_vm0 = vcmp.eq.s32.totalorder %v916_v51, 1 }
 0x303   :  { %v813_v52 = vadd.f32 %v1190_v21, %v809_v48 }
 0x305   :  { %1191 = vlog2.f32 %v813_v52 }
 0x30b   :  { %v1192_v24 = vpop.eup %1191 }
 0x30c   :  { %v816_v17 = vmul.f32 0.6931472, %v1192_v24 }
 0x30e   :  { %v817_v53 = vadd.f32 %v816_v17, %v814_v26 }
 0x310   :  { %v818_v56 = vmax.f32 %v817_v53, -1e+09 }
 0x312   :  { %v832_v45 = vsel %vm831_vm13, %v818_v56, %v789_v30 }
 0x313   :  { %839 = vrot.lane.b32.xlu2 %v832_v45, %s1268_s1  ;;  %836 = vrot.lane.b32.xlu0 %v832_v45, %s1269_s24 }
 0x36d   :  { %v840_v57 = vpop.permute.xlu2 %839 }
 0x36e   :  { %v841_v61 = vsel %vm1602_vm8, %v840_v57, -1e+09 }
 0x385   :  { %v837_v28 = vpop.permute.xlu0 %836 }
 0x386   :  { %v838_v62 = vsel %vm704_vm9, %v837_v28, -1e+09 }
 0x387   :  { %v842_v63 = vmax.f32 %v838_v62, %v841_v61 }
 0x389   :  { %v843_v0 = vmax.f32 %v832_v45, %v842_v63 }
 0x38b   :  { %vm844_vm14 = vcmp.gt.f32.partialorder %v843_v0, -5e+08 }
 0x38c   :  { %v845_v47 = vsel %vm844_vm14, %v843_v0, 0.0 }
 0x38d   :  { %v846_v3 = vsub.f32 %v832_v45, %v845_v47  ;;  %v849_v60 = vsub.f32 %v838_v62, %v845_v47  ;;  %v853_v4 = vsub.f32 %v841_v61, %v845_v47  ;;  %v857_v2 = vadd.f32 %v845_v47, %v835_v10 }
 0x38f   :  { %v847_v6 = vmul.f32 1.442695, %v846_v3  ;;  %v850_v7 = vmul.f32 1.442695, %v849_v60  ;;  %v854_v54 = vmul.f32 1.442695, %v853_v4 }
 0x390   :  { %v921_v4 = vld [vmem:[#allocation2 + $0x28] sm:$0xff] }
 0x391   :  { %1193 = vpow2.f32 %v847_v6 }
 0x392   :  { %1195 = vpow2.f32 %v850_v7 }
 0x393   :  { %1197 = vpow2.f32 %v854_v54 }
 0x397   :  { %v1194_v55 = vpop.eup %1193 }
 0x398   :  { %v1196_v8 = vpop.eup %1195 }
 0x399   :  { %v852_v58 = vadd.f32 %v1196_v8, %v1194_v55  ;;  %v1198_v1 = vpop.eup %1197  ;;  %v959_v55 = vpop.permute.xlu1 %958 }
 0x39a   :  { %vm960_vm1 = vcmp.eq.s32.totalorder %v959_v55, 1 }
 0x39b   :  { %v856_v9 = vadd.f32 %v1198_v1, %v852_v58 }
 0x39d   :  { %1199 = vlog2.f32 %v856_v9 }
 0x3a3   :  { %v1200_v42 = vpop.eup %1199 }
 0x3a4   :  { %v859_v11 = vmul.f32 0.6931472, %v1200_v42 }
 0x3a6   :  { %v860_v12 = vadd.f32 %v859_v11, %v857_v2 }
 0x3a8   :  { %v861_v13 = vmax.f32 %v860_v12, -1e+09 }
 0x3aa   :  { %v875_v14 = vsel %vm874_vm2, %v861_v13, %v832_v45 }
 0x3ab   :  { %882 = vrot.lane.b32.xlu2 %v875_v14, %s1268_s1  ;;  %879 = vrot.lane.b32.xlu0 %v875_v14, %s1269_s24 }
 0x405   :  { %v883_v15 = vpop.permute.xlu2 %882 }
 0x406   :  { %v884_v50 = vsel %vm1602_vm8, %v883_v15, -1e+09 }
 0x41d   :  { %v880_v16 = vpop.permute.xlu0 %879 }
 0x41e   :  { %v881_v19 = vsel %vm704_vm9, %v880_v16, -1e+09 }
 0x41f   :  { %v885_v20 = vmax.f32 %v881_v19, %v884_v50 }
 0x421   :  { %v886_v22 = vmax.f32 %v875_v14, %v885_v20 }
 0x423   :  { %vm887_vm3 = vcmp.gt.f32.partialorder %v886_v22, -5e+08 }
 0x424   :  { %v888_v23 = vsel %vm887_vm3, %v886_v22, 0.0 }
 0x425   :  { %v889_v27 = vsub.f32 %v875_v14, %v888_v23  ;;  %v892_v29 = vsub.f32 %v881_v19, %v888_v23  ;;  %v896_v30 = vsub.f32 %v884_v50, %v888_v23  ;;  %v900_v39 = vadd.f32 %v888_v23, %v878_v38 }
 0x427   :  { %v890_v31 = vmul.f32 1.442695, %v889_v27  ;;  %v893_v40 = vmul.f32 1.442695, %v892_v29  ;;  %v897_v32 = vmul.f32 1.442695, %v896_v30 }
 0x428   :  { %v964_v30 = vld [vmem:[#allocation2 + $0x30] sm:$0xff] }
 0x429   :  { %1201 = vpow2.f32 %v890_v31 }
 0x42a   :  { %1203 = vpow2.f32 %v893_v40 }
 0x42b   :  { %1205 = vpow2.f32 %v897_v32 }
 0x42f   :  { %v1202_v25 = vpop.eup %1201 }
 0x430   :  { %v1204_v33 = vpop.eup %1203 }
 0x431   :  { %v895_v35 = vadd.f32 %v1204_v33, %v1202_v25  ;;  %v1206_v34 = vpop.eup %1205  ;;  %v1002_v25 = vpop.permute.xlu1 %1001 }
 0x432   :  { %vm1003_vm5 = vcmp.eq.s32.totalorder %v1002_v25, 1 }
 0x433   :  { %v899_v36 = vadd.f32 %v1206_v34, %v895_v35  ;;  %v1053_v35 = vld [vmem:[%s1658_s3] sm:$0xff] }
 0x435   :  { %1207 = vlog2.f32 %v899_v36  ;;  %v1054_v36 = vmul.u32 2, %v1053_v35 }
 0x43b   :  { %v1208_v37 = vpop.eup %1207 }
 0x43c   :  { %v902_v41 = vmul.f32 0.6931472, %v1208_v37  ;;  %v1134_v37 = vadd.s32 4294967295, %v1054_v36 }
 0x43e   :  { %v903_v43 = vadd.f32 %v902_v41, %v900_v39 }
 0x440   :  { %v904_v44 = vmax.f32 %v903_v43, -1e+09 }
 0x442   :  { %v918_v48 = vsel %vm917_vm0, %v904_v44, %v875_v14 }
 0x443   :  { %925 = vrot.lane.b32.xlu2 %v918_v48, %s1268_s1  ;;  %922 = vrot.lane.b32.xlu0 %v918_v48, %s1269_s24 }
 0x49d   :  { %v926_v21 = vpop.permute.xlu2 %925 }
 0x49e   :  { %v927_v24 = vsel %vm1602_vm8, %v926_v21, -1e+09 }
 0x4b5   :  { %v923_v52 = vpop.permute.xlu0 %922 }
 0x4b6   :  { %v924_v46 = vsel %vm704_vm9, %v923_v52, -1e+09 }
 0x4b7   :  { %v928_v26 = vmax.f32 %v924_v46, %v927_v24 }
 0x4b9   :  { %v929_v17 = vmax.f32 %v918_v48, %v928_v26 }
 0x4bb   :  { %vm930_vm15 = vcmp.gt.f32.partialorder %v929_v17, -5e+08 }
 0x4bc   :  { %v931_v53 = vsel %vm930_vm15, %v929_v17, 0.0 }
 0x4bd   :  { %v932_v59 = vsub.f32 %v918_v48, %v931_v53  ;;  %v935_v56 = vsub.f32 %v924_v46, %v931_v53  ;;  %v939_v45 = vsub.f32 %v927_v24, %v931_v53  ;;  %v943_v6 = vadd.f32 %v931_v53, %v921_v4 }
 0x4bf   :  { %v933_v57 = vmul.f32 1.442695, %v932_v59  ;;  %v936_v28 = vmul.f32 1.442695, %v935_v56  ;;  %v940_v61 = vmul.f32 1.442695, %v939_v45 }
 0x4c1   :  { %1209 = vpow2.f32 %v933_v57 }
 0x4c2   :  { %1211 = vpow2.f32 %v936_v28 }
 0x4c3   :  { %1213 = vpow2.f32 %v940_v61 }
 0x4c7   :  { %v1210_v62 = vpop.eup %1209 }
 0x4c8   :  { %v1212_v63 = vpop.eup %1211 }
 0x4c9   :  { %v938_v0 = vadd.f32 %v1212_v63, %v1210_v62  ;;  %v1214_v47 = vpop.eup %1213  ;;  %v1007_v62 = vld [vmem:[#allocation2 + $0x38] sm:$0xff] }
 0x4cb   :  { %v942_v3 = vadd.f32 %v1214_v47, %v938_v0  ;;  %v1045_v47 = vpop.permute.xlu1 %1044 }
 0x4cc   :  { %vm1046_vm10 = vcmp.eq.s32.totalorder %v1045_v47, 1 }
 0x4cd   :  { %1215 = vlog2.f32 %v942_v3 }
 0x4d3   :  { %v1216_v60 = vpop.eup %1215 }
 0x4d4   :  { %v945_v7 = vmul.f32 0.6931472, %v1216_v60 }
 0x4d6   :  { %v946_v54 = vadd.f32 %v945_v7, %v943_v6 }
 0x4d8   :  { %v947_v8 = vmax.f32 %v946_v54, -1e+09 }
 0x4da   :  { %v961_v58 = vsel %vm960_vm1, %v947_v8, %v918_v48 }
 0x4db   :  { %968 = vrot.lane.b32.xlu2 %v961_v58, %s1268_s1  ;;  %965 = vrot.lane.b32.xlu0 %v961_v58, %s1269_s24 }
 0x535   :  { %v969_v1 = vpop.permute.xlu2 %968 }
 0x536   :  { %v970_v42 = vsel %vm1602_vm8, %v969_v1, -1e+09 }
 0x54d   :  { %v966_v9 = vpop.permute.xlu0 %965 }
 0x54e   :  { %v967_v10 = vsel %vm704_vm9, %v966_v9, -1e+09 }
 0x54f   :  { %v971_v2 = vmax.f32 %v967_v10, %v970_v42 }
 0x551   :  { %v972_v11 = vmax.f32 %v961_v58, %v971_v2 }
 0x553   :  { %vm973_vm4 = vcmp.gt.f32.partialorder %v972_v11, -5e+08 }
 0x554   :  { %v974_v12 = vsel %vm973_vm4, %v972_v11, 0.0 }
 0x555   :  { %v975_v49 = vsub.f32 %v961_v58, %v974_v12  ;;  %v978_v13 = vsub.f32 %v967_v10, %v974_v12  ;;  %v982_v14 = vsub.f32 %v970_v42, %v974_v12  ;;  %v986_v31 = vadd.f32 %v974_v12, %v964_v30 }
 0x557   :  { %v976_v15 = vmul.f32 1.442695, %v975_v49  ;;  %v979_v16 = vmul.f32 1.442695, %v978_v13  ;;  %v983_v50 = vmul.f32 1.442695, %v982_v14 }
 0x559   :  { %1217 = vpow2.f32 %v976_v15 }
 0x55a   :  { %1219 = vpow2.f32 %v979_v16 }
 0x55b   :  { %1221 = vpow2.f32 %v983_v50 }
 0x55f   :  { %v1218_v19 = vpop.eup %1217 }
 0x560   :  { %v1220_v20 = vpop.eup %1219 }
 0x561   :  { %v981_v22 = vadd.f32 %v1220_v20, %v1218_v19  ;;  %v1222_v23 = vpop.eup %1221 }
 0x563   :  { %v985_v27 = vadd.f32 %v1222_v23, %v981_v22 }
 0x565   :  { %1223 = vlog2.f32 %v985_v27 }
 0x56b   :  { %v1224_v29 = vpop.eup %1223 }
 0x56c   :  { %v988_v40 = vmul.f32 0.6931472, %v1224_v29 }
 0x56e   :  { %v989_v32 = vadd.f32 %v988_v40, %v986_v31 }
 0x570   :  { %v990_v33 = vmax.f32 %v989_v32, -1e+09 }
 0x572   :  { %v1004_v34 = vsel %vm1003_vm5, %v990_v33, %v961_v58 }
 0x573   :  { %1011 = vrot.lane.b32.xlu2 %v1004_v34, %s1268_s1  ;;  %1008 = vrot.lane.b32.xlu0 %v1004_v34, %s1269_s24 }
 0x57b   :  { %1057 = vperm.xlu0 %1143, %v1134_v37   ;;  %1061 = vperm.xlu2 %1144, %v1054_v36  }
 0x5cd   :  { %v1012_v38 = vpop.permute.xlu2 %1011 }
 0x5ce   :  { %v1013_v41 = vsel %vm1602_vm8, %v1012_v38, -1e+09 }
 0x5d5   :  { %v1062_v57 = vpop.permute.xlu2 %1061 }
 0x5d6   :  { %vm1063_vm7 = vcmp.eq.s32.totalorder %v1594_v18, %v1062_v57 }
 0x5e5   :  { %v1009_v39 = vpop.permute.xlu0 %1008 }
 0x5e6   :  { %v1010_v43 = vsel %vm704_vm9, %v1009_v39, -1e+09 }
 0x5e7   :  { %v1014_v51 = vmax.f32 %v1010_v43, %v1013_v41 }
 0x5e9   :  { %v1015_v44 = vmax.f32 %v1004_v34, %v1014_v51 }
 0x5eb   :  { %vm1016_vm6 = vcmp.gt.f32.partialorder %v1015_v44, -5e+08 }
 0x5ec   :  { %v1017_v48 = vsel %vm1016_vm6, %v1015_v44, 0.0 }
 0x5ed   :  { %v1018_v21 = vsub.f32 %v1004_v34, %v1017_v48  ;;  %v1021_v52 = vsub.f32 %v1010_v43, %v1017_v48  ;;  %v1025_v24 = vsub.f32 %v1013_v41, %v1017_v48  ;;  %v1058_v28 = vpop.permute.xlu0 %1057  ;;  %v1029_v63 = vadd.f32 %v1017_v48, %v1007_v62 }
 0x5ee   :  { %vm1059_vm8 = vcmp.eq.s32.totalorder %v1594_v18, %v1058_v28 }
 0x5ef   :  { %v1019_v46 = vmul.f32 1.442695, %v1018_v21  ;;  %v1022_v26 = vmul.f32 1.442695, %v1021_v52  ;;  %v1026_v17 = vmul.f32 1.442695, %v1025_v24  ;;  %vm1064_vm9 = vmor %vm1059_vm8, %vm1063_vm7 }
 0x5f1   :  { %1225 = vpow2.f32 %v1019_v46 }
 0x5f2   :  { %1227 = vpow2.f32 %v1022_v26 }
 0x5f3   :  { %1229 = vpow2.f32 %v1026_v17 }
 0x5f7   :  { %v1226_v53 = vpop.eup %1225 }
 0x5f8   :  { %v1228_v59 = vpop.eup %1227 }
 0x5f9   :  { %v1024_v5 = vadd.f32 %v1228_v59, %v1226_v53  ;;  %v1230_v56 = vpop.eup %1229 }
 0x5fb   :  { %v1028_v45 = vadd.f32 %v1230_v56, %v1024_v5 }
 0x5fd   :  { %1231 = vlog2.f32 %v1028_v45 }
 0x603   :  { %v1232_v61 = vpop.eup %1231 }
 0x604   :  { %v1031_v0 = vmul.f32 0.6931472, %v1232_v61 }
 0x606   :  { %v1032_v3 = vadd.f32 %v1031_v0, %v1029_v63 }
 0x608   :  { %v1033_v60 = vmax.f32 %v1032_v3, -1e+09 }
 0x60a   :  { %v1047_v4 = vsel %vm1046_vm10, %v1033_v60, %v1004_v34 }
 0x60b   :  { %v1065_v6 = vsel %vm1064_vm9, %v1047_v4, -1e+09 }
 0x60c   :  { %1066 = vmax.xlane.f32.xlu1 %v1065_v6 }
 0x67f   :  { %v1067_v7 = vpop.xlane.xlu1 %1066 }
 0x680   :  { %vm1068_vm11 = vcmp.gt.f32.partialorder %v1067_v7, -5e+08 }
 0x681   :  { %v1069_v54 = vsel %vm1068_vm11, %v1067_v7, 0.0 }
 0x682   :  { %v1070_v55 = vsub.f32 %v1065_v6, %v1069_v54 }
 0x684   :  { %v1071_v8 = vmul.f32 1.442695, %v1070_v55 }
 0x686   :  { %1233 = vpow2.f32 %v1071_v8 }
 0x68c   :  { %v1234_v58 = vpop.eup %1233 }
 0x68d   :  { %1073 = vadd.xlane.f32.xlu2 %v1234_v58 }
 0x700   :  { %v1074_v1 = vpop.xlane.xlu2 %1073 }
 0x701   :  { %1235 = vlog2.f32 %v1074_v1 }
 0x707   :  { %v1236_v9 = vpop.eup %1235 }
 0x708   :  { %v1076_v18 = vmul.f32 0.6931472, %v1236_v9 }
 0x70a   :  { %v1077_v42 = vadd.f32 %v1076_v18, %v1069_v54 }
 0x70c   :  { %v1078_v10 = vsub.f32 0.0, %v1077_v42 }
 0x70e   :  { %1080 = vst.msk [vmem:[%s1659_s4] sm:$0xff] %vm1079_vm12, %v1078_v10 }
 0x70f   :  { %1085 = vsyncpa [#allocation5], 1 }

</bundles_post_ra>
